<compile_context>
chip_gen: v7x
topology: tpu7x:2x2x1
jax: 0.10.0
libtpu: 0.0.40
codegen_flags: <defaults>
</compile_context>

<pallas_src>
import jax
import jax.numpy as jnp
from jax.experimental import pallas as pl
from jax.experimental.pallas import tpu as pltpu

IN_FEATURES = 20
MLP_SIZE = (30, 30, 10)
OUT_FEATURES = 1
BN_EPS = 1e-5
# Batch tile (multiple of 128). Sweep 2048-8192 for large batches; at TB=4096
# the double-buffered x block is ~4 MiB and in-kernel activations a few MiB,
# well inside the 16/32 MiB scoped-VMEM defaults on v5e/v6e/v7x.
DEFAULT_TB = 4096

# Contract the minor (lane) dims of both operands: A @ B^T (same form the TPU
# flash-attention kernel uses for q @ k^T).
_TRANS_B = (((1,), (1,)), ((), ()))


def ncf_kernel(counts_ref,          # scalar prefetch (SMEM): valid rows per tile
               x_ref,               # (TB, 20)  natural batch-major layout
               w1g_ref,             # (32, 20)  rows 0:30 = W1, row 30 = folded GMF
               w2_ref,              # (30, 30)
               w3_ref,              # (10, 30)
               wfa_ref,             # (1, 10)   final weight, MLP-branch half
               bn_ref,              # (32, 8)   packed BN params + folded final bias
               o_ref):              # (1, TB)
    tb = x_ref.shape[0]
    n = counts_ref[pl.program_id(0)]                 # valid batch columns this tile
    inv_n = 1.0 / n.astype(jnp.float32)

    # Lane mask over the batch (1.0 on valid columns). Used to (a) mask layer
    # outputs so padded lanes stay exactly zero, (b) mask the MXU row sums.
    col = jax.lax.broadcasted_iota(jnp.int32, (1, tb), 1)
    mask = (col < n).astype(jnp.float32)             # (1, TB)

    def bn_relu(z, gamma, beta):
        # Training-mode BatchNorm1d (biased batch variance) + ReLU.
        # Statistics on the MXU: sums = z @ mask^T, sum(z^2) = diag(z @ z^T).
        # z is exactly 0 in padded lanes, so the Gram diagonal is pre-masked.
        f = z.shape[0]
        sums = jax.lax.dot_general(z, mask, _TRANS_B,
                                   preferred_element_type=jnp.float32)   # (F, 1)
        gram = jax.lax.dot_general(z, z, _TRANS_B,
                                   preferred_element_type=jnp.float32)   # (F, F)
        r = jax.lax.broadcasted_iota(jnp.int32, (f, f), 0)
        c = jax.lax.broadcasted_iota(jnp.int32, (f, f), 1)
        sumsq = jnp.sum(jnp.where(r == c, gram, 0.0), axis=1, keepdims=True)  # (F, 1)
        mean = sums * inv_n
        var = sumsq * inv_n - mean * mean
        scale = gamma * jax.lax.rsqrt(var + BN_EPS)      # rsqrt -> EUP (free slot)
        shift = beta - mean * scale                      # (F, 1); one broadcast each
        return jnp.maximum(z * scale + shift, 0.0)

    bn = bn_ref[...]
    g1, be1 = bn[0:30, 0:1], bn[0:30, 1:2]
    g2, be2 = bn[0:30, 2:3], bn[0:30, 3:4]
    g3, be3 = bn[0:10, 4:5], bn[0:10, 5:6]
    bf = bn[0:1, 6:7]                                 # folded final bias

    x = x_ref[...]                                    # (TB, 20)

    # Single MXU pass over x (x's minor dim is the contraction); rows 0:30 feed
    # the MLP, row 30 is the GMF branch already folded through the final linear.
    z_all = jax.lax.dot_general(w1g_ref[...], x, _TRANS_B,
                                preferred_element_type=jnp.float32)      # (32, TB)
    z1 = z_all[0:MLP_SIZE[0], :]                      # (30, TB)
    y_gmf = z_all[MLP_SIZE[0]:MLP_SIZE[0] + 1, :]     # (1, TB)

    # Layer 1: Linear(20->30) + BN + ReLU (no shortcut); mask output -> padded
    # lanes stay exactly zero for the next layer's MXU statistics.
    h1 = bn_relu(z1, g1, be1) * mask
    # Layer 2: Linear(30->30) + BN + ReLU + residual shortcut (in == out).
    h2 = h1 + bn_relu(
        jnp.dot(w2_ref[...], h1, preferred_element_type=jnp.float32), g2, be2) * mask
    # Layer 3: Linear(30->10) + BN + ReLU (in != out -> no shortcut). No output
    # mask needed: padded lanes of the final row are sliced off on the host.
    h3 = bn_relu(
        jnp.dot(w3_ref[...], h2, preferred_element_type=jnp.float32), g3, be3)

    # Final Linear over concat([h3, gmf]) == wfa @ h3 + folded GMF row + bias; ReLU.
    y = jnp.dot(wfa_ref[...], h3, preferred_element_type=jnp.float32) + y_gmf + bf
    o_ref[...] = jnp.maximum(y, 0.0)


def init_params(key):
    """Deterministic params in PyTorch conventions: Linear W is (out,in), b is (out,)."""
    def linear(k, fan_in, fan_out):
        k1, k2 = jax.random.split(k)
        bound = 1.0 / jnp.sqrt(jnp.float32(fan_in))
        w = jax.random.uniform(k1, (fan_out, fan_in), jnp.float32, -bound, bound)
        b = jax.random.uniform(k2, (fan_out,), jnp.float32, -bound, bound)
        return w, b

    def bn(k, feats):
        k1, k2 = jax.random.split(k)
        gamma = 1.0 + 0.1 * jax.random.uniform(k1, (feats,), jnp.float32, -1.0, 1.0)
        beta = 0.1 * jax.random.uniform(k2, (feats,), jnp.float32, -1.0, 1.0)
        return gamma, beta

    keys = jax.random.split(key, 8)
    w1, b1 = linear(keys[0], IN_FEATURES, MLP_SIZE[0]); g1, be1 = bn(keys[1], MLP_SIZE[0])
    w2, b2 = linear(keys[2], MLP_SIZE[0], MLP_SIZE[1]); g2, be2 = bn(keys[3], MLP_SIZE[1])
    w3, b3 = linear(keys[4], MLP_SIZE[1], MLP_SIZE[2]); g3, be3 = bn(keys[5], MLP_SIZE[2])
    wg, bg = linear(keys[6], IN_FEATURES, MLP_SIZE[2])
    wf, bf = linear(keys[7], 2 * MLP_SIZE[2], OUT_FEATURES)
    return (w1, b1, g1, be1, w2, b2, g2, be2, w3, b3, g3, be3, wg, bg, wf, bf)


def pack_kernel_params(params):
    """Host-side algebraic folding + packing into the kernel's input layout."""
    (w1, b1, g1, be1, w2, b2, g2, be2, w3, b3, g3, be3, wg, bg, wf, bf) = params
    wfa = wf[:, :MLP_SIZE[2]]                 # (1, 10)  -> multiplies h3
    wfb = wf[:, MLP_SIZE[2]:]                 # (1, 10)  -> multiplies GMF output
    wg_fold = wfb @ wg                        # (1, 20)  GMF folded through final linear
    bf_fold = bf + wfb @ bg                   # (1,)
    # b1/b2/b3 are dropped: a constant pre-BN bias is cancelled by the batch mean
    # (training-mode BN).  This also keeps z exactly zero in zero-padded batch lanes.
    w1g = jnp.zeros((32, IN_FEATURES), jnp.float32)
    w1g = w1g.at[0:MLP_SIZE[0], :].set(w1).at[MLP_SIZE[0], :].set(wg_fold[0])
    bn = jnp.zeros((32, 8), jnp.float32)
    bn = bn.at[0:30, 0].set(g1).at[0:30, 1].set(be1)
    bn = bn.at[0:30, 2].set(g2).at[0:30, 3].set(be2)
    bn = bn.at[0:10, 4].set(g3).at[0:10, 5].set(be3)
    bn = bn.at[0, 6].set(bf_fold[0])
    return w1g, w2, w3, wfa, bn


def _round_up(n, m):
    return ((n + m - 1) // m) * m


def ncf_forward(x, params, tb=DEFAULT_TB):
    B = x.shape[0]
    x = x.astype(jnp.float32)
    w1g, w2, w3, wfa, bn = pack_kernel_params(params)

    # Shrink the tile to what the batch needs (multiple of 128) so small batches
    # stay a single tile (exact full-batch BN) with minimal padding.
    tb = min(tb, _round_up(B, 128))
    ntiles = pl.cdiv(B, tb)
    b_pad = ntiles * tb
    if b_pad != B:
        # Zero rows keep z exactly 0 in padded lanes; the BN stats rely on this.
        x = jnp.pad(x, ((0, b_pad - B), (0, 0)))
    counts = jnp.array([min(tb, B - i * tb) for i in range(ntiles)], dtype=jnp.int32)

    grid_spec = pltpu.PrefetchScalarGridSpec(
        num_scalar_prefetch=1,
        grid=(ntiles,),
        in_specs=[
            pl.BlockSpec((tb, IN_FEATURES), lambda i, c: (i, 0)),   # x tile, natural layout
            pl.BlockSpec(w1g.shape, lambda i, c: (0, 0)),           # resident weights
            pl.BlockSpec(w2.shape, lambda i, c: (0, 0)),
            pl.BlockSpec(w3.shape, lambda i, c: (0, 0)),
            pl.BlockSpec(wfa.shape, lambda i, c: (0, 0)),
            pl.BlockSpec(bn.shape, lambda i, c: (0, 0)),            # packed BN slab
        ],
        out_specs=pl.BlockSpec((1, tb), lambda i, c: (0, i)),       # lane-dense output row
    )
    out = pl.pallas_call(
        ncf_kernel,
        out_shape=jax.ShapeDtypeStruct((1, b_pad), jnp.float32),
        grid_spec=grid_spec,
        compiler_params=pltpu.CompilerParams(
            dimension_semantics=("parallel",)),     # megacore sharding on v7x
    )(counts, x, w1g, w2, w3, wfa, bn)
    return out[:, :B].T                             # (B, 1)


def ncf_reference(x, params):
    """Literal (un-folded) PyTorch math for validation: training-mode BN."""
    (w1, b1, g1, be1, w2, b2, g2, be2, w3, b3, g3, be3, wg, bg, wf, bf) = params

    def bn_relu(z, gamma, beta):
        mean = jnp.mean(z, axis=0, keepdims=True)
        var = jnp.mean((z - mean) ** 2, axis=0, keepdims=True)
        return jnp.maximum((z - mean) / jnp.sqrt(var + BN_EPS) * gamma + beta, 0.0)

    h1 = bn_relu(x @ w1.T + b1, g1, be1)
    h2 = h1 + bn_relu(h1 @ w2.T + b2, g2, be2)
    h3 = bn_relu(h2 @ w3.T + b3, g3, be3)
    g = x @ wg.T + bg
    y = jnp.concatenate([h3, g], axis=1) @ wf.T + bf
    return jnp.maximum(y, 0.0)


if __name__ == "__main__":
    key = jax.random.PRNGKey(0)
    kx, kp = jax.random.split(key)
    B = 384   # single tile -> exact full-batch BN semantics
    x = jax.random.normal(kx, (B, IN_FEATURES), jnp.float32)
    params = init_params(kp)

    out = jax.block_until_ready(ncf_forward(x, params))
    ref = ncf_reference(x, params)

    assert out.shape == (B, OUT_FEATURES)
    assert jnp.allclose(out, ref, rtol=1e-4, atol=1e-4), (out, ref)
    print("KERNEL_OK")
</pallas_src>

<mosaic_0001>
module attributes {stable_mosaic.version = 11 : i64} {
  func.func @ncf_kernel(%arg0: i32, %arg1: memref<1xi32, #tpu.memory_space<smem>>, %arg2: memref<384x20xf32, #tpu.memory_space<vmem>>, %arg3: memref<32x20xf32, #tpu.memory_space<vmem>>, %arg4: memref<30x30xf32, #tpu.memory_space<vmem>>, %arg5: memref<10x30xf32, #tpu.memory_space<vmem>>, %arg6: memref<1x10xf32, #tpu.memory_space<vmem>>, %arg7: memref<32x8xf32, #tpu.memory_space<vmem>>, %arg8: memref<1x384xf32, #tpu.memory_space<vmem>>) attributes {dimension_semantics = [#tpu.dimension_semantics<parallel>], iteration_bounds = array<i64: 1>, scalar_prefetch = 1 : i64, scratch_operands = 0 : i64, tpu.core_type = #tpu.core_type<tc>, window_params = [{transform_indices = @transform_0, window_bounds = array<i64: 384, 20>}, {pipeline_mode = #tpu.pipeline_mode<synchronous>, transform_indices = @transform_1, window_bounds = array<i64: 32, 20>}, {pipeline_mode = #tpu.pipeline_mode<synchronous>, transform_indices = @transform_2, window_bounds = array<i64: 30, 30>}, {pipeline_mode = #tpu.pipeline_mode<synchronous>, transform_indices = @transform_3, window_bounds = array<i64: 10, 30>}, {pipeline_mode = #tpu.pipeline_mode<synchronous>, transform_indices = @transform_4, window_bounds = array<i64: 1, 10>}, {pipeline_mode = #tpu.pipeline_mode<synchronous>, transform_indices = @transform_5, window_bounds = array<i64: 32, 8>}, {transform_indices = @transform_6, window_bounds = array<i64: 1, 384>}]} {
    %0 = arith.index_cast %arg0 : i32 to index
    %1 = memref.load %arg1[%0] : memref<1xi32, #tpu.memory_space<smem>>
    %2 = arith.sitofp %1 : i32 to f32
    %cst = arith.constant 1.000000e+00 : f32
    %3 = arith.divf %cst, %2 : f32
    %4 = tpu.iota {dimensions = array<i32: 1>} : vector<1x384xi32>
    %5 = vector.broadcast %1 : i32 to vector<1x384xi32>
    %6 = arith.cmpi slt, %4, %5 : vector<1x384xi32>
    %7 = arith.extui %6 : vector<1x384xi1> to vector<1x384xi32>
    %8 = arith.sitofp %7 : vector<1x384xi32> to vector<1x384xf32>
    %c0 = arith.constant 0 : index
    %c0_0 = arith.constant 0 : index
    %9 = vector.load %arg7[%c0, %c0_0] : memref<32x8xf32, #tpu.memory_space<vmem>>, vector<32x8xf32>
    %10 = vector.extract_strided_slice %9 {offsets = [0, 0], sizes = [30, 1], strides = [1, 1]} : vector<32x8xf32> to vector<30x1xf32>
    %11 = vector.extract_strided_slice %9 {offsets = [0, 1], sizes = [30, 1], strides = [1, 1]} : vector<32x8xf32> to vector<30x1xf32>
    %12 = vector.extract_strided_slice %9 {offsets = [0, 2], sizes = [30, 1], strides = [1, 1]} : vector<32x8xf32> to vector<30x1xf32>
    %13 = vector.extract_strided_slice %9 {offsets = [0, 3], sizes = [30, 1], strides = [1, 1]} : vector<32x8xf32> to vector<30x1xf32>
    %14 = vector.extract_strided_slice %9 {offsets = [0, 4], sizes = [10, 1], strides = [1, 1]} : vector<32x8xf32> to vector<10x1xf32>
    %15 = vector.extract_strided_slice %9 {offsets = [0, 5], sizes = [10, 1], strides = [1, 1]} : vector<32x8xf32> to vector<10x1xf32>
    %16 = vector.extract_strided_slice %9 {offsets = [0, 6], sizes = [1, 1], strides = [1, 1]} : vector<32x8xf32> to vector<1x1xf32>
    %c0_1 = arith.constant 0 : index
    %c0_2 = arith.constant 0 : index
    %17 = vector.load %arg2[%c0_1, %c0_2] : memref<384x20xf32, #tpu.memory_space<vmem>>, vector<384x20xf32>
    %c0_3 = arith.constant 0 : index
    %c0_4 = arith.constant 0 : index
    %18 = vector.load %arg3[%c0_3, %c0_4] : memref<32x20xf32, #tpu.memory_space<vmem>>, vector<32x20xf32>
    %cst_5 = arith.constant dense<0.000000e+00> : vector<32x384xf32>
    %19 = tpu.matmul %18, %17, %cst_5 {dimension_numbers = #tpu.dot_dimension_numbers<[1], [1], [0], [0], [0, 0, 1, 0], [], []>} : vector<32x20xf32>, vector<384x20xf32>, vector<32x384xf32> -> vector<32x384xf32>
    %20 = vector.extract_strided_slice %19 {offsets = [0, 0], sizes = [30, 384], strides = [1, 1]} : vector<32x384xf32> to vector<30x384xf32>
    %21 = vector.extract_strided_slice %19 {offsets = [30, 0], sizes = [1, 384], strides = [1, 1]} : vector<32x384xf32> to vector<1x384xf32>
    %cst_6 = arith.constant dense<0.000000e+00> : vector<30x1xf32>
    %22 = tpu.matmul %20, %8, %cst_6 {dimension_numbers = #tpu.dot_dimension_numbers<[1], [1], [0], [0], [0, 0, 1, 0], [], []>} : vector<30x384xf32>, vector<1x384xf32>, vector<30x1xf32> -> vector<30x1xf32>
    %cst_7 = arith.constant dense<0.000000e+00> : vector<30x30xf32>
    %23 = tpu.matmul %20, %20, %cst_7 {dimension_numbers = #tpu.dot_dimension_numbers<[1], [1], [0], [0], [0, 0, 1, 0], [], []>} : vector<30x384xf32>, vector<30x384xf32>, vector<30x30xf32> -> vector<30x30xf32>
    %24 = tpu.iota {dimensions = array<i32: 0>} : vector<30x30xi32>
    %25 = tpu.iota {dimensions = array<i32: 1>} : vector<30x30xi32>
    %26 = arith.cmpi eq, %24, %25 : vector<30x30xi32>
    %cst_8 = arith.constant 0.000000e+00 : f32
    %27 = vector.broadcast %cst_8 : f32 to vector<30x30xf32>
    %28 = arith.select %26, %23, %27 : vector<30x30xi1>, vector<30x30xf32>
    %cst_9 = arith.constant dense<0.000000e+00> : vector<30xf32>
    %29 = vector.multi_reduction <add>, %28, %cst_9 [1] : vector<30x30xf32> to vector<30xf32>
    %30 = vector.shape_cast %29 : vector<30xf32> to vector<30x1xf32>
    %31 = vector.broadcast %3 : f32 to vector<30x1xf32>
    %32 = arith.mulf %22, %31 : vector<30x1xf32>
    %33 = vector.broadcast %3 : f32 to vector<30x1xf32>
    %34 = arith.mulf %30, %33 : vector<30x1xf32>
    %35 = arith.mulf %32, %32 : vector<30x1xf32>
    %36 = arith.subf %34, %35 : vector<30x1xf32>
    %cst_10 = arith.constant 9.99999974E-6 : f32
    %37 = vector.broadcast %cst_10 : f32 to vector<30x1xf32>
    %38 = arith.addf %36, %37 : vector<30x1xf32>
    %39 = math.rsqrt %38 : vector<30x1xf32>
    %40 = arith.mulf %10, %39 : vector<30x1xf32>
    %41 = arith.mulf %32, %40 : vector<30x1xf32>
    %42 = arith.subf %11, %41 : vector<30x1xf32>
    %43 = vector.broadcast %40 : vector<30x1xf32> to vector<30x384xf32>
    %44 = arith.mulf %20, %43 : vector<30x384xf32>
    %45 = vector.broadcast %42 : vector<30x1xf32> to vector<30x384xf32>
    %46 = arith.addf %44, %45 : vector<30x384xf32>
    %cst_11 = arith.constant 0.000000e+00 : f32
    %47 = vector.broadcast %cst_11 : f32 to vector<30x384xf32>
    %48 = arith.maximumf %46, %47 : vector<30x384xf32>
    %49 = vector.broadcast %8 : vector<1x384xf32> to vector<30x384xf32>
    %50 = arith.mulf %48, %49 : vector<30x384xf32>
    %c0_12 = arith.constant 0 : index
    %c0_13 = arith.constant 0 : index
    %51 = vector.load %arg4[%c0_12, %c0_13] : memref<30x30xf32, #tpu.memory_space<vmem>>, vector<30x30xf32>
    %cst_14 = arith.constant dense<0.000000e+00> : vector<30x384xf32>
    %52 = tpu.matmul %51, %50, %cst_14 {dimension_numbers = #tpu.dot_dimension_numbers<[1], [0], [0], [1], [0, 0, 1, 1], [], []>} : vector<30x30xf32>, vector<30x384xf32>, vector<30x384xf32> -> vector<30x384xf32>
    %cst_15 = arith.constant dense<0.000000e+00> : vector<30x1xf32>
    %53 = tpu.matmul %52, %8, %cst_15 {dimension_numbers = #tpu.dot_dimension_numbers<[1], [1], [0], [0], [0, 0, 1, 0], [], []>} : vector<30x384xf32>, vector<1x384xf32>, vector<30x1xf32> -> vector<30x1xf32>
    %cst_16 = arith.constant dense<0.000000e+00> : vector<30x30xf32>
    %54 = tpu.matmul %52, %52, %cst_16 {dimension_numbers = #tpu.dot_dimension_numbers<[1], [1], [0], [0], [0, 0, 1, 0], [], []>} : vector<30x384xf32>, vector<30x384xf32>, vector<30x30xf32> -> vector<30x30xf32>
    %55 = tpu.iota {dimensions = array<i32: 0>} : vector<30x30xi32>
    %56 = tpu.iota {dimensions = array<i32: 1>} : vector<30x30xi32>
    %57 = arith.cmpi eq, %55, %56 : vector<30x30xi32>
    %cst_17 = arith.constant 0.000000e+00 : f32
    %58 = vector.broadcast %cst_17 : f32 to vector<30x30xf32>
    %59 = arith.select %57, %54, %58 : vector<30x30xi1>, vector<30x30xf32>
    %cst_18 = arith.constant dense<0.000000e+00> : vector<30xf32>
    %60 = vector.multi_reduction <add>, %59, %cst_18 [1] : vector<30x30xf32> to vector<30xf32>
    %61 = vector.shape_cast %60 : vector<30xf32> to vector<30x1xf32>
    %62 = vector.broadcast %3 : f32 to vector<30x1xf32>
    %63 = arith.mulf %53, %62 : vector<30x1xf32>
    %64 = vector.broadcast %3 : f32 to vector<30x1xf32>
    %65 = arith.mulf %61, %64 : vector<30x1xf32>
    %66 = arith.mulf %63, %63 : vector<30x1xf32>
    %67 = arith.subf %65, %66 : vector<30x1xf32>
    %cst_19 = arith.constant 9.99999974E-6 : f32
    %68 = vector.broadcast %cst_19 : f32 to vector<30x1xf32>
    %69 = arith.addf %67, %68 : vector<30x1xf32>
    %70 = math.rsqrt %69 : vector<30x1xf32>
    %71 = arith.mulf %12, %70 : vector<30x1xf32>
    %72 = arith.mulf %63, %71 : vector<30x1xf32>
    %73 = arith.subf %13, %72 : vector<30x1xf32>
    %74 = vector.broadcast %71 : vector<30x1xf32> to vector<30x384xf32>
    %75 = arith.mulf %52, %74 : vector<30x384xf32>
    %76 = vector.broadcast %73 : vector<30x1xf32> to vector<30x384xf32>
    %77 = arith.addf %75, %76 : vector<30x384xf32>
    %cst_20 = arith.constant 0.000000e+00 : f32
    %78 = vector.broadcast %cst_20 : f32 to vector<30x384xf32>
    %79 = arith.maximumf %77, %78 : vector<30x384xf32>
    %80 = vector.broadcast %8 : vector<1x384xf32> to vector<30x384xf32>
    %81 = arith.mulf %79, %80 : vector<30x384xf32>
    %82 = arith.addf %50, %81 : vector<30x384xf32>
    %c0_21 = arith.constant 0 : index
    %c0_22 = arith.constant 0 : index
    %83 = vector.load %arg5[%c0_21, %c0_22] : memref<10x30xf32, #tpu.memory_space<vmem>>, vector<10x30xf32>
    %cst_23 = arith.constant dense<0.000000e+00> : vector<10x384xf32>
    %84 = tpu.matmul %83, %82, %cst_23 {dimension_numbers = #tpu.dot_dimension_numbers<[1], [0], [0], [1], [0, 0, 1, 1], [], []>} : vector<10x30xf32>, vector<30x384xf32>, vector<10x384xf32> -> vector<10x384xf32>
    %cst_24 = arith.constant dense<0.000000e+00> : vector<10x1xf32>
    %85 = tpu.matmul %84, %8, %cst_24 {dimension_numbers = #tpu.dot_dimension_numbers<[1], [1], [0], [0], [0, 0, 1, 0], [], []>} : vector<10x384xf32>, vector<1x384xf32>, vector<10x1xf32> -> vector<10x1xf32>
    %cst_25 = arith.constant dense<0.000000e+00> : vector<10x10xf32>
    %86 = tpu.matmul %84, %84, %cst_25 {dimension_numbers = #tpu.dot_dimension_numbers<[1], [1], [0], [0], [0, 0, 1, 0], [], []>} : vector<10x384xf32>, vector<10x384xf32>, vector<10x10xf32> -> vector<10x10xf32>
    %87 = tpu.iota {dimensions = array<i32: 0>} : vector<10x10xi32>
    %88 = tpu.iota {dimensions = array<i32: 1>} : vector<10x10xi32>
    %89 = arith.cmpi eq, %87, %88 : vector<10x10xi32>
    %cst_26 = arith.constant 0.000000e+00 : f32
    %90 = vector.broadcast %cst_26 : f32 to vector<10x10xf32>
    %91 = arith.select %89, %86, %90 : vector<10x10xi1>, vector<10x10xf32>
    %cst_27 = arith.constant dense<0.000000e+00> : vector<10xf32>
    %92 = vector.multi_reduction <add>, %91, %cst_27 [1] : vector<10x10xf32> to vector<10xf32>
    %93 = vector.shape_cast %92 : vector<10xf32> to vector<10x1xf32>
    %94 = vector.broadcast %3 : f32 to vector<10x1xf32>
    %95 = arith.mulf %85, %94 : vector<10x1xf32>
    %96 = vector.broadcast %3 : f32 to vector<10x1xf32>
    %97 = arith.mulf %93, %96 : vector<10x1xf32>
    %98 = arith.mulf %95, %95 : vector<10x1xf32>
    %99 = arith.subf %97, %98 : vector<10x1xf32>
    %cst_28 = arith.constant 9.99999974E-6 : f32
    %100 = vector.broadcast %cst_28 : f32 to vector<10x1xf32>
    %101 = arith.addf %99, %100 : vector<10x1xf32>
    %102 = math.rsqrt %101 : vector<10x1xf32>
    %103 = arith.mulf %14, %102 : vector<10x1xf32>
    %104 = arith.mulf %95, %103 : vector<10x1xf32>
    %105 = arith.subf %15, %104 : vector<10x1xf32>
    %106 = vector.broadcast %103 : vector<10x1xf32> to vector<10x384xf32>
    %107 = arith.mulf %84, %106 : vector<10x384xf32>
    %108 = vector.broadcast %105 : vector<10x1xf32> to vector<10x384xf32>
    %109 = arith.addf %107, %108 : vector<10x384xf32>
    %cst_29 = arith.constant 0.000000e+00 : f32
    %110 = vector.broadcast %cst_29 : f32 to vector<10x384xf32>
    %111 = arith.maximumf %109, %110 : vector<10x384xf32>
    %c0_30 = arith.constant 0 : index
    %c0_31 = arith.constant 0 : index
    %112 = vector.load %arg6[%c0_30, %c0_31] : memref<1x10xf32, #tpu.memory_space<vmem>>, vector<1x10xf32>
    %cst_32 = arith.constant dense<0.000000e+00> : vector<1x384xf32>
    %113 = tpu.matmul %112, %111, %cst_32 {dimension_numbers = #tpu.dot_dimension_numbers<[1], [0], [0], [1], [0, 0, 1, 1], [], []>} : vector<1x10xf32>, vector<10x384xf32>, vector<1x384xf32> -> vector<1x384xf32>
    %114 = arith.addf %113, %21 : vector<1x384xf32>
    %115 = vector.broadcast %16 : vector<1x1xf32> to vector<1x384xf32>
    %116 = arith.addf %114, %115 : vector<1x384xf32>
    %cst_33 = arith.constant 0.000000e+00 : f32
    %117 = vector.broadcast %cst_33 : f32 to vector<1x384xf32>
    %118 = arith.maximumf %116, %117 : vector<1x384xf32>
    %c0_34 = arith.constant 0 : index
    %c0_35 = arith.constant 0 : index
    %119 = vector.load %arg8[%c0_34, %c0_35] : memref<1x384xf32, #tpu.memory_space<vmem>>, vector<1x384xf32>
    tpu.vector_store %arg8[%c0_34, %c0_35], %118 {strides = array<i32>} : memref<1x384xf32, #tpu.memory_space<vmem>>, vector<1x384xf32>,
    return
  }
  func.func @transform_0(%arg0: i32, %arg1: memref<1xi32, #tpu.memory_space<smem>>) -> (i32, i32) {
    %c0_i32 = arith.constant 0 : i32
    %c0_i32_0 = arith.constant 0 : i32
    return %arg0, %c0_i32 : i32, i32
  }
  func.func @transform_1(%arg0: i32, %arg1: memref<1xi32, #tpu.memory_space<smem>>) -> (i32, i32) {
    %c0_i32 = arith.constant 0 : i32
    %c0_i32_0 = arith.constant 0 : i32
    %c0_i32_1 = arith.constant 0 : i32
    return %c0_i32, %c0_i32_0 : i32, i32
  }
  func.func @transform_2(%arg0: i32, %arg1: memref<1xi32, #tpu.memory_space<smem>>) -> (i32, i32) {
    %c0_i32 = arith.constant 0 : i32
    %c0_i32_0 = arith.constant 0 : i32
    %c0_i32_1 = arith.constant 0 : i32
    return %c0_i32, %c0_i32_0 : i32, i32
  }
  func.func @transform_3(%arg0: i32, %arg1: memref<1xi32, #tpu.memory_space<smem>>) -> (i32, i32) {
    %c0_i32 = arith.constant 0 : i32
    %c0_i32_0 = arith.constant 0 : i32
    %c0_i32_1 = arith.constant 0 : i32
    return %c0_i32, %c0_i32_0 : i32, i32
  }
  func.func @transform_4(%arg0: i32, %arg1: memref<1xi32, #tpu.memory_space<smem>>) -> (i32, i32) {
    %c0_i32 = arith.constant 0 : i32
    %c0_i32_0 = arith.constant 0 : i32
    %c0_i32_1 = arith.constant 0 : i32
    return %c0_i32, %c0_i32_0 : i32, i32
  }
  func.func @transform_5(%arg0: i32, %arg1: memref<1xi32, #tpu.memory_space<smem>>) -> (i32, i32) {
    %c0_i32 = arith.constant 0 : i32
    %c0_i32_0 = arith.constant 0 : i32
    %c0_i32_1 = arith.constant 0 : i32
    return %c0_i32, %c0_i32_0 : i32, i32
  }
  func.func @transform_6(%arg0: i32, %arg1: memref<1xi32, #tpu.memory_space<smem>>) -> (i32, i32) {
    %c0_i32 = arith.constant 0 : i32
    %c0_i32_0 = arith.constant 0 : i32
    return %c0_i32, %arg0 : i32, i32
  }
}

</mosaic_0001>

<bundles_post_ra>
// kernel: tpu_custom_call.1
= control target key start
LH: loop header
LB: loop body
LE: loop exit
PB: predicated region body
PF: predicated region fallthrough
CT: control target
= control target key end

     0   :  { %vm101_vm0 = vcmask 162816   ;;  %s3379_s0 = inlined_call_operand.<no memory space> [shape: s32[1], index: 0, kind: input, shape index: {}]   ;;  %s3380_s1 = inlined_call_operand.vmem [shape: f32[384,20], index: 1, kind: input, shape index: {}]   ;;  %s3381_s2 = inlined_call_operand.vmem [shape: f32[32,20], index: 2, kind: input, shape index: {}]   ;;  %s3382_s3 = inlined_call_operand.vmem [shape: f32[30,30], index: 3, kind: input, shape index: {}]   ;;  %s3383_s4 = inlined_call_operand.vmem [shape: f32[10,30], index: 4, kind: input, shape index: {}]   ;;  %s3384_s5 = inlined_call_operand.vmem [shape: f32[1,10], index: 5, kind: input, shape index: {}]   ;;  %s3385_s6 = inlined_call_operand.vmem [shape: f32[32,8], index: 6, kind: input, shape index: {}]   ;;  %s3386_s7 = inlined_call_operand.hbm [shape: f32[1,384], index: 7, kind: output, shape index: {}]  }
   0x1   :  { %v65_v0 = vld [vmem:[%s3380_s1 + $0x80] sm:$0xff]  ;;  %v66_v1 = vld [vmem:[%s3380_s1 + $0x88] sm:$0xff]  ;;  %vm2611_vm1 = vmpackc.low %vm101_vm0, %vm101_vm0 }
   0x2   :  { %v81_v2 = vld [vmem:[%s3380_s1 + $0x100] sm:$0xff]  ;;  %v2285_v3 = vpack.c.bf16 %v66_v1, %v65_v0  ;;  %v82_v5 = vld [vmem:[%s3380_s1 + $0x108] sm:$0xff]  ;;  %v67_v9 = vld [vmem:[%s3380_s1 + $0x90] sm:$0xff] }
   0x3   :  { %v49_v6 = vld [vmem:[%s3380_s1] sm:$0xff]  ;;  %v2333_v7 = vpack.c.bf16 %v82_v5, %v81_v2  ;;  %v50_v8 = vld [vmem:[%s3380_s1 + $0x8] sm:$0xff]  ;;  %v68_v10 = vld [vmem:[%s3380_s1 + $0x98] sm:$0xff] }
   0x4   :  { %2287 = vmatprep.subr.msk.bf16.mxu0 %vm2611_vm1, %v2285_v3  ;;  %v2288_v11 = vpack.c.bf16 %v50_v8, %v49_v6  ;;  %v2291_v12 = vpack.c.bf16 %v68_v10, %v67_v9  ;;  %v83_v13 = vld [vmem:[%s3380_s1 + $0x110] sm:$0xff]  ;;  %v84_v14 = vld [vmem:[%s3380_s1 + $0x118] sm:$0xff]  ;;  %v69_v18 = vld [vmem:[%s3380_s1 + $0xa0] sm:$0xff] }
   0x5   :  { %2335 = vmatprep.subr.msk.bf16.mxu1 %vm2611_vm1, %v2333_v7  ;;  %v2339_v15 = vpack.c.bf16 %v84_v14, %v83_v13  ;;  %v51_v16 = vld [vmem:[%s3380_s1 + $0x10] sm:$0xff]  ;;  %v52_v17 = vld [vmem:[%s3380_s1 + $0x18] sm:$0xff]  ;;  %v70_v19 = vld [vmem:[%s3380_s1 + $0xa8] sm:$0xff] }
   0x6   :  { %2290 = vmatpush3.bf16.xpose.msk.msra.mxu0 %vm2611_vm1, %v2288_v11  ;;  %2338 = vmatpush3.bf16.xpose.msk.msra.mxu1 %vm2611_vm1, %v2333_v7  ;;  %v85_v20 = vld [vmem:[%s3380_s1 + $0x120] sm:$0xff]  ;;  %v86_v21 = vld [vmem:[%s3380_s1 + $0x128] sm:$0xff]  ;;  %v2294_v22 = vpack.c.bf16 %v52_v17, %v51_v16  ;;  %v2297_v23 = vpack.c.bf16 %v70_v19, %v69_v18  ;;  %v71_v27 = vld [vmem:[%s3380_s1 + $0xb0] sm:$0xff] }
   0x7   :  { %2293 = vmatprep.subr.msk.bf16.mxu0 %vm2611_vm1, %v2291_v12  ;;  %2341 = vmatprep.subr.msk.bf16.mxu1 %vm2611_vm1, %v2339_v15  ;;  %v2345_v24 = vpack.c.bf16 %v86_v21, %v85_v20  ;;  %v53_v25 = vld [vmem:[%s3380_s1 + $0x20] sm:$0xff]  ;;  %v54_v26 = vld [vmem:[%s3380_s1 + $0x28] sm:$0xff]  ;;  %v72_v28 = vld [vmem:[%s3380_s1 + $0xb8] sm:$0xff] }
   0x8   :  { %v87_v29 = vld [vmem:[%s3380_s1 + $0x130] sm:$0xff]  ;;  %v88_v30 = vld [vmem:[%s3380_s1 + $0x138] sm:$0xff]  ;;  %v2695_v31 = vld [vmem:[%s3381_s2] sm:$0xff]  ;;  %v2300_v32 = vpack.c.bf16 %v54_v26, %v53_v25 }
   0x9   :  { %2115 = vmatprep.mubr.msk.f32.mxu0 %vm101_vm0, %v2695_v31  ;;  %2212 = vmatprep.mubr.msk.f32.mxu1 %vm101_vm0, %v2695_v31 }
   0xe   :  { %2296 = vmatpush3.bf16.xpose.msk.msra.mxu0 %vm2611_vm1, %v2294_v22  ;;  %2344 = vmatpush3.bf16.xpose.msk.msra.mxu1 %vm2611_vm1, %v2339_v15 }
   0xf   :  { %2299 = vmatprep.subr.msk.bf16.mxu0 %vm2611_vm1, %v2297_v23  ;;  %2347 = vmatprep.subr.msk.bf16.mxu1 %vm2611_vm1, %v2345_v24 }
  0x10   :  { %13 = vsyncpa [#allocation5], 0  ;;  %v2303_v33 = vpack.c.bf16 %v72_v28, %v71_v27  ;;  %v2351_v34 = vpack.c.bf16 %v88_v30, %v87_v29  ;;  %v55_v35 = vld [vmem:[%s3380_s1 + $0x30] sm:$0xff]  ;;  %v56_v36 = vld [vmem:[%s3380_s1 + $0x38] sm:$0xff]  ;;  %s27_s14 = scvt.s32.f32 %s3379_s0  ;;  %v31_v15 = vlaneseq  ;;  %v35_v19 = vstv %s3379_s0  ;;  %s2548_s20 = smov 1  }
  0x11   :  { %v73_v37 = vld [vmem:[%s3380_s1 + $0xc0] sm:$0xff]  ;;  %v74_v38 = vld [vmem:[%s3380_s1 + $0xc8] sm:$0xff]  ;;  %v2306_v41 = vpack.c.bf16 %v56_v36, %v55_v35  ;;  %v75_v46 = vld [vmem:[%s3380_s1 + $0xd0] sm:$0xff]  ;;  %v2546_v20 = vmov 0.0   ;;  %vm456_vm5 = vcmask 1045504   ;;  %vm647_vm7 = vcmask 244736  }
  0x12   :  { %v89_v39 = vld [vmem:[%s3380_s1 + $0x140] sm:$0xff]  ;;  %v90_v40 = vld [vmem:[%s3380_s1 + $0x148] sm:$0xff]  ;;  %v2309_v42 = vpack.c.bf16 %v74_v38, %v73_v37  ;;  %v76_v47 = vld [vmem:[%s3380_s1 + $0xd8] sm:$0xff]  ;;  %v28_v13 = vstv %s27_s14  ;;  %v2847_v16 = vand.u32 127, %v31_v15  ;;  %vm657_vm11 = vcmask 242688  }
  0x13   :  { %v2357_v43 = vpack.c.bf16 %v90_v40, %v89_v39  ;;  %v57_v44 = vld [vmem:[%s3380_s1 + $0x40] sm:$0xff]  ;;  %v58_v45 = vld [vmem:[%s3380_s1 + $0x48] sm:$0xff]  ;;  %v91_v48 = vld [vmem:[%s3380_s1 + $0x150] sm:$0xff]  ;;  %v2315_v51 = vpack.c.bf16 %v76_v47, %v75_v46  ;;  %2500 = vrcp.f32 %v28_v13  ;;  %vm2550_vm12 = vmmov 1  }
  0x14   :  { %v92_v49 = vld [vmem:[%s3380_s1 + $0x158] sm:$0xff]  ;;  %v2312_v50 = vpack.c.bf16 %v58_v45, %v57_v44  ;;  %v59_v53 = vld [vmem:[%s3380_s1 + $0x50] sm:$0xff]  ;;  %v77_v55 = vld [vmem:[%s3380_s1 + $0xe0] sm:$0xff]  ;;  %v33_v17 = vadd.s32 128, %v2847_v16  ;;  %v34_v18 = vadd.s32 256, %v2847_v16  ;;  %vm36_vm2 = vcmp.lt.s32.totalorder %v2847_v16, %v35_v19 }
  0x15   :  { %v2363_v52 = vpack.c.bf16 %v92_v49, %v91_v48  ;;  %v60_v54 = vld [vmem:[%s3380_s1 + $0x58] sm:$0xff]  ;;  %v78_v56 = vld [vmem:[%s3380_s1 + $0xe8] sm:$0xff]  ;;  %v93_v57 = vld [vmem:[%s3380_s1 + $0x160] sm:$0xff]  ;;  %v2856_v21 = vsel %vm36_vm2, 1.0, %v2546_v20  ;;  %vm1549_vm14 = vcmask 1041408   ;;  %vm1709_vm15 = vcmask 80896  }
  0x16   :  { %2302 = vmatpush3.bf16.xpose.msk.msra.mxu0 %vm2611_vm1, %v2300_v32  ;;  %2350 = vmatpush3.bf16.xpose.msk.msra.mxu1 %vm2611_vm1, %v2345_v24  ;;  %v94_v58 = vld [vmem:[%s3380_s1 + $0x168] sm:$0xff]  ;;  %v2318_v59 = vpack.c.bf16 %v60_v54, %v59_v53  ;;  %v2321_v60 = vpack.c.bf16 %v78_v56, %v77_v55  ;;  %v61_v62 = vld [vmem:[%s3380_s1 + $0x60] sm:$0xff]  ;;  %v79_v0 = vld [vmem:[%s3380_s1 + $0xf0] sm:$0xff]  ;;  %vm37_vm3 = vcmp.lt.s32.totalorder %v33_v17, %v35_v19 }
  0x17   :  { %2305 = vmatprep.subr.msk.bf16.mxu0 %vm2611_vm1, %v2303_v33  ;;  %2353 = vmatprep.subr.msk.bf16.mxu1 %vm2611_vm1, %v2351_v34  ;;  %v2369_v61 = vpack.c.bf16 %v94_v58, %v93_v57  ;;  %v62_v63 = vld [vmem:[%s3380_s1 + $0x68] sm:$0xff]  ;;  %v80_v1 = vld [vmem:[%s3380_s1 + $0xf8] sm:$0xff]  ;;  %v95_v2 = vld [vmem:[%s3380_s1 + $0x170] sm:$0xff]  ;;  %vm38_vm4 = vcmp.lt.s32.totalorder %v34_v18, %v35_v19  ;;  %v2859_v22 = vsel %vm37_vm3, 1.0, %v2546_v20  ;;  %vm1984_vm3 = vcmp.lt.s32.totalorder %v31_v15, 384 }
  0x18   :  { %v96_v3 = vld [vmem:[%s3380_s1 + $0x178] sm:$0xff]  ;;  %v2324_v5 = vpack.c.bf16 %v62_v63, %v61_v62  ;;  %v2327_v6 = vpack.c.bf16 %v80_v1, %v79_v0  ;;  %v63_v8 = vld [vmem:[%s3380_s1 + $0x70] sm:$0xff]  ;;  %v98_v11 = vld [vmem:[%s3381_s2 + $0x8] sm:$0xff]  ;;  %v2862_v23 = vsel %vm38_vm4, 1.0, %v2546_v20 }
  0x19   :  { %v2375_v7 = vpack.c.bf16 %v96_v3, %v95_v2  ;;  %v64_v9 = vld [vmem:[%s3380_s1 + $0x78] sm:$0xff]  ;;  %v99_v12 = vld [vmem:[%s3381_s2 + $0x10] sm:$0xff]  ;;  %v2941_v2 = vshrl.u32 %v31_v15, 7  ;;  %vm3083_vm13 = vmpackc.low %vm456_vm5, %vm2550_vm12 }
  0x1a   :  { %v2330_v10 = vpack.c.bf16 %v64_v9, %v63_v8  ;;  %v100_v4 = vld [vmem:[%s3381_s2 + $0x18] sm:$0xff]  ;;  %vm2462_vm2 = vmpackc.low %vm1549_vm14, %vm2550_vm12 }
  0x1b   :  { %vm639_vm6 = vcmp.eq.s32.totalorder %v2941_v2, %v2847_v16  ;;  %v2955_v13 = vadd.s32 16, %v2941_v2 }
  0x1d   :  { %v2501_v14 = vpop.eup %2500  ;;  %vm641_vm9 = vcmp.eq.s32.totalorder %v2955_v13, %v2847_v16 }
  0x1e   :  { %2308 = vmatpush3.bf16.xpose.msk.msra.mxu0 %vm2611_vm1, %v2306_v41  ;;  %2356 = vmatpush3.bf16.xpose.msk.msra.mxu1 %vm2611_vm1, %v2351_v34  ;;  %2471 = vpush %v2501_v14 }
  0x1f   :  { %2311 = vmatprep.subr.msk.bf16.mxu0 %vm2611_vm1, %v2309_v42  ;;  %2359 = vmatprep.subr.msk.bf16.mxu1 %vm2611_vm1, %v2357_v43 }
  0x26   :  { %2314 = vmatpush3.bf16.xpose.msk.msra.mxu0 %vm2611_vm1, %v2312_v50  ;;  %2362 = vmatpush3.bf16.xpose.msk.msra.mxu1 %vm2611_vm1, %v2357_v43 }
  0x27   :  { %2317 = vmatprep.subr.msk.bf16.mxu0 %vm2611_vm1, %v2315_v51  ;;  %2365 = vmatprep.subr.msk.bf16.mxu1 %vm2611_vm1, %v2363_v52 }
  0x2e   :  { %2320 = vmatpush3.bf16.xpose.msk.msra.mxu0 %vm2611_vm1, %v2318_v59  ;;  %2368 = vmatpush3.bf16.xpose.msk.msra.mxu1 %vm2611_vm1, %v2363_v52 }
  0x2f   :  { %2323 = vmatprep.subr.msk.bf16.mxu0 %vm2611_vm1, %v2321_v60  ;;  %2371 = vmatprep.subr.msk.bf16.mxu1 %vm2611_vm1, %v2369_v61 }
  0x36   :  { %2326 = vmatpush3.bf16.xpose.msk.msra.mxu0 %vm2611_vm1, %v2324_v5  ;;  %2374 = vmatpush3.bf16.xpose.msk.msra.mxu1 %vm2611_vm1, %v2369_v61 }
  0x37   :  { %2329 = vmatprep.subr.msk.bf16.mxu0 %vm2611_vm1, %v2327_v6  ;;  %2377 = vmatprep.subr.msk.bf16.mxu1 %vm2611_vm1, %v2375_v7 }
  0x3e   :  { %2332 = vmatpush3.bf16.xpose.msk.msra.mxu0 %vm2611_vm1, %v2330_v10  ;;  %2380 = vmatpush3.bf16.xpose.msk.msra.mxu1 %vm2611_vm1, %v2375_v7  ;;  %v2946_v7 = vadd.s32 8, %v2941_v2  ;;  %vm2556_vm1 = vmmov 0  }
  0x40   :  { %vm640_vm8 = vcmp.eq.s32.totalorder %v2946_v7, %v2847_v16 }
  0x45   :  { %2116 = vmatmul.mubr.msk.f32.vlgmr.msra.gmra.mrb[0].mxu0 %vm101_vm0, %v2695_v31  ;;  %2213 = vmatmul.mubr.msk.f32.vlgmr.msra.gmra.mrb[0].mxu1 %vm101_vm0, %v98_v11 }
  0x46   :  { %2117 = vmatprep.mubr.msk.f32.mxu0 %vm101_vm0, %v98_v11  ;;  %2215 = vmatprep.mubr.msk.f32.mxu1 %vm101_vm0, %v99_v12 }
  0x49   :  { %2118 = vmatmul.mubr.msk.f32.gmra.mrb[2].mxu0 %vm101_vm0, %v98_v11  ;;  %2216 = vmatmul.mubr.msk.f32.gmra.mrb[2].mxu1 %vm101_vm0, %v100_v4 }
  0x4a   :  { %2119 = vmatprep.mubr.msk.f32.mxu0 %vm101_vm0, %v99_v12 }
  0x4d   :  { %2120 = vmatmul.mubr.msk.f32.gmra.mrb[4].mxu0 %vm101_vm0, %v99_v12 }
  0x4e   :  { %2121 = vmatprep.mubr.msk.f32.mxu0 %vm101_vm0, %v100_v4 }
  0x4f   :  { %s2472_s0 = spop %2471 }
  0x51   :  { %2122 = vmatmul.mubr.msk.f32.gmra.mrb[6].mxu0 %vm101_vm0, %v100_v4  ;;  %vm1713_vm0 = vcmask 74752  }
 0x118   :  { %v2864_v24 = vpop.f32.mrb[0].mxu0  ;;  %v2866_v25 = vpop.f32.mrb[0].mxu1 }
 0x119   :  { %v2868_v26 = vpop.f32.mrb[1].mxu0  ;;  %v2870_v27 = vpop.f32.mrb[1].mxu1  ;;  %v432_v28 = vmul.f32 %v2856_v21, %v2864_v24  ;;  %v437_v44 = vmul.f32 %v2866_v25, %v2862_v23 }
 0x11a   :  { %528 = vmatprep.mubr.f32.mxu0 %v2868_v26  ;;  %v2389_v29 = vpack.c.bf16 %v2866_v25, %v2870_v27  ;;  %2226 = vmatprep.mubr.f32.mxu1 %v2870_v27  ;;  %v433_v30 = vmul.f32 %v2859_v22, %v2868_v26  ;;  %v434_v31 = vmul.f32 %v2862_v23, %v2870_v27 }
 0x11c   :  { %v2882_v32 = vpop.f32.mrb[2].mxu0  ;;  %2390 = vmatprep.subr.bf16.mxu1 %v2389_v29  ;;  %v2884_v33 = vpop.f32.mrb[2].mxu1  ;;  %v444_v34 = vadd.f32 %v433_v30, %v432_v28 }
 0x11d   :  { %v2383_v35 = vpack.c.bf16 %v2882_v32, %v2864_v24  ;;  %v2888_v36 = vpop.f32.mrb[3].mxu0  ;;  %2392 = vmatpush3.bf16.xpose.msra.mxu1 %v2389_v29  ;;  %v2890_v37 = vpop.f32.mrb[3].mxu1  ;;  %v435_v38 = vmul.f32 %v2856_v21, %v2882_v32  ;;  %v443_v59 = vmul.f32 %v2884_v33, %v2862_v23  ;;  %v2964_v29 = vadd.s32 24, %v2941_v2 }
 0x11e   :  { %v2381_v39 = vpack.c.bf16 %v2888_v36, %v2868_v26  ;;  %v445_v40 = vadd.f32 %v444_v34, %v434_v31  ;;  %v2393_v41 = vpack.c.bf16 %v2884_v33, %v2890_v37  ;;  %v436_v42 = vmul.f32 %v2859_v22, %v2888_v36 }
 0x11f   :  { %v440_v50 = vmul.f32 %v2862_v23, %v2890_v37  ;;  %v460_v63 = vsel %vm456_vm5, %v443_v59, 0.0  ;;  %vm642_vm10 = vcmp.eq.s32.totalorder %v2964_v29, %v2847_v16 }
 0x120   :  { %v2900_v43 = vpop.f32.mrb[4].mxu0  ;;  %2382 = vmatprep.subr.bf16.mxu0 %v2381_v39  ;;  %446 = vadd.xlane.f32.xlu0 %v445_v40  ;;  %v448_v45 = vadd.f32 %v436_v42, %v435_v38 }
 0x121   :  { %v2904_v46 = vpop.f32.mrb[5].mxu0  ;;  %2384 = vmatpush1.bf16.xpose.msra.mxu0 %v2383_v35  ;;  %2394 = vmatprep.subr.bf16.mxu1 %v2393_v41  ;;  %v438_v47 = vmul.f32 %v2856_v21, %v2900_v43 }
 0x122   :  { %v449_v48 = vadd.f32 %v448_v45, %v437_v44  ;;  %v439_v49 = vmul.f32 %v2859_v22, %v2904_v46  ;;  %v2547_v44 = vmov 0  }
 0x123   :  { %2487 = vset.pattern.permute.xlu0 %v2547_v44  ;;  %2488 = vset.pattern.permute.xlu1 %v2547_v44 }
 0x124   :  { %v2912_v51 = vpop.f32.mrb[6].mxu0  ;;  %450 = vadd.xlane.f32.xlu0 %v449_v48  ;;  %v452_v52 = vadd.f32 %v439_v49, %v438_v47  ;;  %v2976_v47 = vstv %s2472_s0 }
 0x125   :  { %v2914_v53 = vpop.f32.mrb[7].mxu0  ;;  %2396 = vmatpush3.bf16.xpose.msra.mxu1 %v2393_v41  ;;  %v2387_v54 = vpack.c.bf16 %v2912_v51, %v2900_v43  ;;  %v441_v55 = vmul.f32 %v2856_v21, %v2912_v51 }
 0x126   :  { %v2385_v56 = vpack.c.bf16 %v2914_v53, %v2904_v46  ;;  %v453_v57 = vadd.f32 %v452_v52, %v440_v50  ;;  %v442_v58 = vmul.f32 %v2859_v22, %v2914_v53 }
 0x127   :  { %v457_v60 = vsel %vm456_vm5, %v441_v55, 0.0 }
 0x128   :  { %2386 = vmatprep.subr.bf16.mxu0 %v2385_v56  ;;  %454 = vadd.xlane.f32.xlu0 %v453_v57  ;;  %v458_v61 = vsel %vm456_vm5, %v442_v58, 0.0 }
 0x129   :  { %2388 = vmatpush1.bf16.xpose.msra.mxu0 %v2387_v54  ;;  %v459_v62 = vadd.f32 %v458_v61, %v457_v60 }
 0x12b   :  { %v461_v0 = vadd.f32 %v460_v63, %v459_v62 }
 0x12c   :  { %2227 = vmatmul.mubr.f32.vlgmr.msra.gmra.mrb[4].mxu1 %v2866_v25 }
 0x12d   :  { %2229 = vmatprep.mubr.f32.mxu1 %v2890_v37  ;;  %462 = vadd.xlane.f32.xlu1 %v461_v0 }
 0x130   :  { %529 = vmatmul.mubr.f32.vlgmr.msra.gmra.mrb[8].mxu0 %v2864_v24  ;;  %2230 = vmatmul.mubr.f32.gmra.mrb[6].mxu1 %v2884_v33 }
 0x131   :  { %533 = vmatprep.mubr.f32.mxu0 %v2888_v36  ;;  %891 = vmatprep.mubr.f32.mxu1 %v2546_v20 }
 0x134   :  { %534 = vmatmul.mubr.f32.gmra.mrb[10].mxu0 %v2882_v32 }
 0x135   :  { %538 = vmatprep.mubr.f32.mxu0 %v2904_v46 }
 0x138   :  { %539 = vmatmul.mubr.f32.gmra.mrb[12].mxu0 %v2900_v43 }
 0x139   :  { %543 = vmatprep.mubr.f32.mxu0 %v2914_v53 }
 0x13c   :  { %544 = vmatmul.mubr.f32.gmra.mrb[14].mxu0 %v2912_v51 }
 0x1ad   :  { %v447_v45 = vpop.xlane.xlu0 %446 }
 0x1ae   :  { %v662_v50 = vmul.f32 %v2976_v47, %v447_v45 }
 0x1b0   :  { %v670_v54 = vmul.f32 %v662_v50, %v662_v50 }
 0x1b1   :  { %v451_v48 = vpop.xlane.xlu0 %450 }
 0x1b2   :  { %v663_v55 = vmul.f32 %v2976_v47, %v451_v48 }
 0x1b4   :  { %v671_v60 = vmul.f32 %v663_v55, %v663_v55 }
 0x1b5   :  { %v455_v57 = vpop.xlane.xlu0 %454 }
 0x1b6   :  { %v664_v61 = vmul.f32 %v2976_v47, %v455_v57 }
 0x1ba   :  { %v463_v49 = vpop.xlane.xlu1 %462 }
 0x1ff   :  { %v2228_v1 = vpop.f32.mrb[4].mxu1 }
 0x200   :  { %v615_v3 = vpop.f32.mrb[5].mxu1 }
 0x203   :  { %v530_v5 = vpop.f32.mrb[8].mxu0  ;;  %v2231_v6 = vpop.f32.mrb[6].mxu1 }
 0x204   :  { %v616_v8 = vadd.f32 %v615_v3, %v530_v5  ;;  %v532_v9 = vpop.f32.mrb[9].mxu0  ;;  %v625_v10 = vpop.f32.mrb[7].mxu1  ;;  %v672_v3 = vmul.f32 %v664_v61, %v664_v61  ;;  %v665_v5 = vmul.f32 %v2976_v47, %v463_v49  ;;  %v2549_v49 = vmov 1  }
 0x206   :  { %v643_v11 = vsel %vm639_vm6, %v616_v8, 0.0 }
 0x207   :  { %v535_v12 = vpop.f32.mrb[10].mxu0  ;;  %v648_v4 = vsel %vm647_vm7, %v643_v11, 0.0  ;;  %v673_v11 = vmul.f32 %v665_v5, %v665_v5 }
 0x208   :  { %v621_v14 = vadd.f32 %v2228_v1, %v535_v12  ;;  %v537_v17 = vpop.f32.mrb[11].mxu0  ;;  %649 = vadd.xlane.f32.xlu1 %v648_v4 }
 0x209   :  { %v2989_v17 = vld [vmem:[%s3385_s6] sm:$0xff] }
 0x20a   :  { %v644_v18 = vsel %vm640_vm8, %v621_v14, 0.0 }
 0x20b   :  { %v540_v19 = vpop.f32.mrb[12].mxu0  ;;  %v651_v28 = vsel %vm647_vm7, %v644_v18, 0.0 }
 0x20c   :  { %v626_v30 = vadd.f32 %v625_v10, %v540_v19  ;;  %v542_v31 = vpop.f32.mrb[13].mxu0  ;;  %652 = vadd.xlane.f32.xlu1 %v651_v28 }
 0x20e   :  { %v645_v34 = vsel %vm641_vm9, %v626_v30, 0.0  ;;  %v2995_v30 = vld [vmem:[%s3385_s6 + $0x8] sm:$0xff] }
 0x20f   :  { %v545_v35 = vpop.f32.mrb[14].mxu0  ;;  %v654_v38 = vsel %vm647_vm7, %v645_v34, 0.0 }
 0x210   :  { %v631_v39 = vadd.f32 %v2231_v6, %v545_v35  ;;  %v547_v40 = vpop.f32.mrb[15].mxu0  ;;  %655 = vadd.xlane.f32.xlu0 %v654_v38  ;;  %v3002_v38 = vld [vmem:[%s3385_s6 + $0x10] sm:$0xff] }
 0x212   :  { %v646_v41 = vsel %vm642_vm10, %v631_v39, 0.0 }
 0x213   :  { %v658_v42 = vsel %vm657_vm11, %v646_v41, 0.0 }
 0x214   :  { %659 = vadd.xlane.f32.xlu1 %v658_v42  ;;  %v3009_v42 = vld [vmem:[%s3385_s6 + $0x18] sm:$0xff] }
 0x295   :  { %v650_v52 = vpop.xlane.xlu1 %649 }
 0x296   :  { %v666_v56 = vmul.f32 %v2976_v47, %v650_v52 }
 0x298   :  { %v674_v58 = vsub.f32 %v666_v56, %v670_v54 }
 0x299   :  { %v653_v59 = vpop.xlane.xlu1 %652 }
 0x29a   :  { %v678_v62 = vadd.f32 1e-05, %v674_v58  ;;  %v667_v63 = vmul.f32 %v2976_v47, %v653_v59 }
 0x29c   :  { %2502 = vrsqrt.f32 %v678_v62  ;;  %v675_v0 = vsub.f32 %v667_v63, %v671_v60 }
 0x29d   :  { %v656_v1 = vpop.xlane.xlu0 %655 }
 0x29e   :  { %v679_v6 = vadd.f32 1e-05, %v675_v0  ;;  %v668_v8 = vmul.f32 %v2976_v47, %v656_v1 }
 0x2a0   :  { %2504 = vrsqrt.f32 %v679_v6  ;;  %v676_v9 = vsub.f32 %v668_v8, %v672_v3 }
 0x2a1   :  { %v660_v10 = vpop.xlane.xlu1 %659 }
 0x2a2   :  { %v680_v12 = vadd.f32 1e-05, %v676_v9  ;;  %v669_v4 = vmul.f32 %v2976_v47, %v660_v10 }
 0x2a4   :  { %2506 = vrsqrt.f32 %v680_v12  ;;  %v677_v14 = vsub.f32 %v669_v4, %v673_v11 }
 0x2a6   :  { %v2503_v18 = vpop.eup %2502  ;;  %v681_v19 = vadd.f32 1e-05, %v677_v14 }
 0x2a7   :  { %v686_v28 = vmul.f32 %v2503_v18, %v2989_v17 }
 0x2a8   :  { %2508 = vrsqrt.f32 %v681_v19 }
 0x2a9   :  { %v690_v31 = vmul.f32 %v686_v28, %v662_v50 }
 0x2aa   :  { %v2505_v34 = vpop.eup %2504 }
 0x2ab   :  { %698 = vrot.lane.b32.xlu0 %v690_v31, %s2548_s20  ;;  %v687_v35 = vmul.f32 %v2505_v34, %v2995_v30 }
 0x2ad   :  { %v691_v39 = vmul.f32 %v687_v35, %v663_v55 }
 0x2ae   :  { %v2507_v40 = vpop.eup %2506 }
 0x2af   :  { %700 = vrot.lane.b32.xlu1 %v691_v39, %s2548_s20  ;;  %716 = vperm.xlu0 %2487, %v686_v28   ;;  %v688_v41 = vmul.f32 %v2507_v40, %v3002_v38 }
 0x2b1   :  { %v692_v44 = vmul.f32 %v688_v41, %v664_v61  ;;  %v3021_v61 = vld [vmem:[%s3382_s3] sm:$0xff] }
 0x2b2   :  { %v2509_v45 = vpop.eup %2508  ;;  %2240 = vmatprep.mubr.msk.f32.mxu0 %vm647_vm7, %v3021_v61 }
 0x2b3   :  { %702 = vrot.lane.b32.xlu1 %v692_v44, %s2548_s20  ;;  %v689_v48 = vmul.f32 %v2509_v45, %v3009_v42  ;;  %2490 = vset.pattern.permute.xlu0 %v2549_v49 }
 0x2b5   :  { %v693_v50 = vmul.f32 %v689_v48, %v665_v5 }
 0x2b7   :  { %704 = vrot.lane.b32.xlu1 %v693_v50, %s2548_s20 }
 0x2bb   :  { %721 = vperm.xlu1 %2488, %v687_v35  }
 0x2bf   :  { %726 = vperm.xlu1 %2488, %v688_v41  }
 0x2c3   :  { %731 = vperm.xlu1 %2488, %v689_v48  }
 0x2c7   :  { %2489 = vset.pattern.permute.xlu1 %v2549_v49 }
 0x31d   :  { %v699_v52 = vpop.permute.xlu0 %698 }
 0x31e   :  { %v710_v54 = vsub.f32 %v2989_v17, %v699_v52 }
 0x320   :  { %748 = vperm.xlu1 %2489, %v710_v54  }
 0x321   :  { %v701_v55 = vpop.permute.xlu1 %700 }
 0x322   :  { %v711_v56 = vsub.f32 %v2995_v30, %v701_v55 }
 0x324   :  { %753 = vperm.xlu0 %2490, %v711_v56  }
 0x325   :  { %v703_v57 = vpop.permute.xlu1 %702 }
 0x326   :  { %v712_v58 = vsub.f32 %v3002_v38, %v703_v57 }
 0x328   :  { %758 = vperm.xlu0 %2490, %v712_v58  }
 0x329   :  { %v705_v59 = vpop.permute.xlu1 %704 }
 0x32a   :  { %v713_v60 = vsub.f32 %v3009_v42, %v705_v59 }
 0x32c   :  { %763 = vperm.xlu1 %2489, %v713_v60  }
 0x32e   :  { %v717_v0 = vpop.permute.xlu0 %716 }
 0x32f   :  { %v734_v3 = vmul.f32 %v717_v0, %v2864_v24  ;;  %v735_v5 = vmul.f32 %v717_v0, %v2868_v26  ;;  %v736_v6 = vmul.f32 %v717_v0, %v2870_v27 }
 0x33a   :  { %v722_v62 = vpop.permute.xlu1 %721 }
 0x33b   :  { %v737_v12 = vmul.f32 %v722_v62, %v2882_v32  ;;  %v738_v4 = vmul.f32 %v722_v62, %v2888_v36  ;;  %v739_v14 = vmul.f32 %v2866_v25, %v722_v62 }
 0x33e   :  { %v727_v63 = vpop.permute.xlu1 %726 }
 0x33f   :  { %v740_v26 = vmul.f32 %v727_v63, %v2900_v43  ;;  %v741_v41 = vmul.f32 %v727_v63, %v2904_v46  ;;  %v742_v32 = vmul.f32 %v727_v63, %v2890_v37 }
 0x342   :  { %v732_v1 = vpop.permute.xlu1 %731 }
 0x343   :  { %v743_v52 = vmul.f32 %v732_v1, %v2912_v51  ;;  %v744_v55 = vmul.f32 %v732_v1, %v2914_v53  ;;  %v745_v56 = vmul.f32 %v2884_v33, %v732_v1 }
 0x39f   :  { %v749_v8 = vpop.permute.xlu1 %748 }
 0x3a0   :  { %v766_v9 = vadd.f32 %v749_v8, %v734_v3  ;;  %v767_v10 = vadd.f32 %v749_v8, %v735_v5  ;;  %v768_v11 = vadd.f32 %v749_v8, %v736_v6 }
 0x3a2   :  { %v778_v18 = vmax.f32 %v766_v9, 0.0  ;;  %v779_v19 = vmax.f32 %v767_v10, 0.0  ;;  %v780_v31 = vmax.f32 %v768_v11, 0.0 }
 0x3a3   :  { %v754_v28 = vpop.permute.xlu0 %753 }
 0x3a4   :  { %v769_v34 = vadd.f32 %v754_v28, %v737_v12  ;;  %v770_v24 = vadd.f32 %v754_v28, %v738_v4  ;;  %v771_v35 = vadd.f32 %v754_v28, %v739_v14  ;;  %v3035_v36 = vmul.f32 %v2856_v21, %v778_v18 }
 0x3a5   :  { %v3041_v48 = vmul.f32 %v2859_v22, %v779_v19  ;;  %v3044_v43 = vmul.f32 %v2862_v23, %v780_v31 }
 0x3a6   :  { %v781_v27 = vmax.f32 %v769_v34, 0.0  ;;  %v782_v39 = vmax.f32 %v770_v24, 0.0  ;;  %v783_v40 = vmax.f32 %v771_v35, 0.0  ;;  %v803_v34 = vld [vmem:[%s3382_s3 + $0x8] sm:$0xff]  ;;  %v804_v24 = vld [vmem:[%s3382_s3 + $0x10] sm:$0xff] }
 0x3a7   :  { %v759_v25 = vpop.permute.xlu0 %758  ;;  %v805_v35 = vld [vmem:[%s3382_s3 + $0x18] sm:$0x3f] }
 0x3a8   :  { %v3038_v44 = vmul.f32 %v2856_v21, %v781_v27  ;;  %v772_v45 = vadd.f32 %v759_v25, %v740_v26  ;;  %v773_v49 = vadd.f32 %v759_v25, %v741_v41  ;;  %v774_v50 = vadd.f32 %v759_v25, %v742_v32 }
 0x3a9   :  { %v3047_v46 = vmul.f32 %v2859_v22, %v782_v39  ;;  %v3050_v37 = vmul.f32 %v2862_v23, %v783_v40 }
 0x3aa   :  { %v2399_v54 = vpack.c.bf16 %v3038_v44, %v3035_v36  ;;  %v784_v60 = vmax.f32 %v772_v45, 0.0  ;;  %v785_v63 = vmax.f32 %v773_v49, 0.0  ;;  %v786_v0 = vmax.f32 %v774_v50, 0.0 }
 0x3ab   :  { %v764_v57 = vpop.permute.xlu1 %763  ;;  %v2397_v58 = vpack.c.bf16 %v3047_v46, %v3041_v48  ;;  %v2407_v59 = vpack.c.bf16 %v3050_v37, %v3044_v43 }
 0x3ac   :  { %v775_v62 = vadd.f32 %v764_v57, %v743_v52  ;;  %v776_v3 = vadd.f32 %v764_v57, %v744_v55  ;;  %v777_v5 = vadd.f32 %v764_v57, %v745_v56  ;;  %v3062_v9 = vmul.f32 %v2856_v21, %v784_v60 }
 0x3ad   :  { %2398 = vmatprep.subr.bf16.mxu1 %v2397_v58  ;;  %2408 = vmatprep.subr.bf16.mxu0 %v2407_v59  ;;  %v3068_v11 = vmul.f32 %v2859_v22, %v785_v63  ;;  %v3071_v12 = vmul.f32 %v2862_v23, %v786_v0 }
 0x3ae   :  { %v787_v6 = vmax.f32 %v775_v62, 0.0  ;;  %2400 = vmatpush1.bf16.msra.mxu1 %v2399_v54  ;;  %2410 = vmatpush3.bf16.msra.mxu0 %v2407_v59  ;;  %v788_v8 = vmax.f32 %v776_v3, 0.0  ;;  %v789_v1 = vmax.f32 %v777_v5, 0.0 }
 0x3b0   :  { %v3065_v10 = vmul.f32 %v2856_v21, %v787_v6  ;;  %v3074_v4 = vmul.f32 %v2859_v22, %v788_v8  ;;  %v3077_v14 = vmul.f32 %v2862_v23, %v789_v1 }
 0x3b2   :  { %v2404_v18 = vpack.c.bf16 %v3065_v10, %v3062_v9  ;;  %v2401_v28 = vpack.c.bf16 %v3074_v4, %v3068_v11  ;;  %v2411_v31 = vpack.c.bf16 %v3077_v14, %v3071_v12 }
 0x3b4   :  { %2403 = vmatprep.subr.msk.bf16.mxu1 %vm3083_vm13, %v2401_v28  ;;  %2413 = vmatprep.subr.msk.bf16.mxu0 %vm3083_vm13, %v2411_v31 }
 0x3b5   :  { %2406 = vmatpush1.bf16.msk.msra.mxu1 %vm3083_vm13, %v2404_v18  ;;  %2416 = vmatpush3.bf16.msk.msra.mxu0 %vm3083_vm13, %v2411_v31 }
 0x3b8   :  { %2062 = vmatmul.mubr.msk.f32.vlgmr.msra.gmra.mrb[8].mxu1 %vm647_vm7, %v3021_v61  ;;  %2241 = vmatmul.mubr.msk.f32.vlgmr.msra.gmra.mrb[16].mxu0 %vm647_vm7, %v803_v34 }
 0x3b9   :  { %897 = vmatprep.mubr.f32.mxu1 %v2546_v20  ;;  %2243 = vmatprep.mubr.msk.f32.mxu0 %vm647_vm7, %v804_v24 }
 0x3bc   :  { %2063 = vmatmul.mubr.msk.f32.gmra.mrb[10].mxu1 %vm647_vm7, %v803_v34  ;;  %2244 = vmatmul.mubr.msk.f32.gmra.mrb[18].mxu0 %vm647_vm7, %v805_v35 }
 0x3bd   :  { %903 = vmatprep.mubr.f32.mxu1 %v2546_v20 }
 0x3c0   :  { %2064 = vmatmul.mubr.msk.f32.gmra.mrb[12].mxu1 %vm647_vm7, %v804_v24 }
 0x3c1   :  { %909 = vmatprep.mubr.f32.mxu1 %v2546_v20 }
 0x3c4   :  { %2065 = vmatmul.mubr.msk.f32.gmra.mrb[14].mxu1 %vm647_vm7, %v805_v35 }
 0x48b   :  { %v3119_v61 = vpop.f32.mrb[8].mxu1  ;;  %v3121_v26 = vpop.f32.mrb[16].mxu0 }
 0x48c   :  { %v3123_v27 = vpop.f32.mrb[9].mxu1  ;;  %v3125_v39 = vpop.f32.mrb[17].mxu0  ;;  %v1001_v40 = vmul.f32 %v2856_v21, %v3119_v61  ;;  %v1006_v63 = vmul.f32 %v3121_v26, %v2862_v23 }
 0x48d   :  { %1096 = vmatprep.mubr.f32.mxu1 %v3123_v27  ;;  %v2425_v41 = vpack.c.bf16 %v3121_v26, %v3125_v39  ;;  %2254 = vmatprep.mubr.f32.mxu0 %v3125_v39  ;;  %v1002_v32 = vmul.f32 %v2859_v22, %v3123_v27  ;;  %v1003_v25 = vmul.f32 %v2862_v23, %v3125_v39 }
 0x48f   :  { %v3137_v45 = vpop.f32.mrb[10].mxu1  ;;  %2426 = vmatprep.subr.bf16.mxu0 %v2425_v41  ;;  %v3139_v49 = vpop.f32.mrb[18].mxu0  ;;  %v1013_v50 = vadd.f32 %v1002_v32, %v1001_v40 }
 0x490   :  { %v2419_v52 = vpack.c.bf16 %v3137_v45, %v3119_v61  ;;  %v3143_v54 = vpop.f32.mrb[11].mxu1  ;;  %2428 = vmatpush3.bf16.xpose.msra.mxu0 %v2425_v41  ;;  %v3145_v55 = vpop.f32.mrb[19].mxu0  ;;  %v1004_v56 = vmul.f32 %v2856_v21, %v3137_v45  ;;  %v1012_v32 = vmul.f32 %v3139_v49, %v2862_v23 }
 0x491   :  { %v1014_v57 = vadd.f32 %v1013_v50, %v1003_v25  ;;  %v2417_v58 = vpack.c.bf16 %v3143_v54, %v3123_v27  ;;  %v2429_v59 = vpack.c.bf16 %v3139_v49, %v3145_v55  ;;  %v1005_v60 = vmul.f32 %v2859_v22, %v3143_v54 }
 0x492   :  { %v1009_v1 = vmul.f32 %v2862_v23, %v3145_v55 }
 0x493   :  { %1015 = vadd.xlane.f32.xlu0 %v1014_v57  ;;  %v3155_v62 = vpop.f32.mrb[12].mxu1  ;;  %2418 = vmatprep.subr.bf16.mxu1 %v2417_v58  ;;  %v1017_v0 = vadd.f32 %v1005_v60, %v1004_v56  ;;  %v1028_v56 = vsel %vm456_vm5, %v1012_v32, 0.0 }
 0x494   :  { %v3159_v3 = vpop.f32.mrb[13].mxu1  ;;  %2420 = vmatpush1.bf16.xpose.msra.mxu1 %v2419_v52  ;;  %2430 = vmatprep.subr.bf16.mxu0 %v2429_v59  ;;  %v1007_v5 = vmul.f32 %v2856_v21, %v3155_v62 }
 0x495   :  { %v1018_v6 = vadd.f32 %v1017_v0, %v1006_v63  ;;  %v1008_v8 = vmul.f32 %v2859_v22, %v3159_v3 }
 0x497   :  { %1019 = vadd.xlane.f32.xlu1 %v1018_v6  ;;  %v3167_v18 = vpop.f32.mrb[14].mxu1  ;;  %v1021_v28 = vadd.f32 %v1008_v8, %v1007_v5 }
 0x498   :  { %v1010_v31 = vmul.f32 %v2856_v21, %v3167_v18  ;;  %v2423_v34 = vpack.c.bf16 %v3167_v18, %v3155_v62  ;;  %v3173_v24 = vpop.f32.mrb[15].mxu1  ;;  %2432 = vmatpush3.bf16.xpose.msra.mxu0 %v2429_v59 }
 0x499   :  { %v1011_v35 = vmul.f32 %v2859_v22, %v3173_v24  ;;  %v1022_v40 = vadd.f32 %v1021_v28, %v1009_v1  ;;  %v2421_v41 = vpack.c.bf16 %v3173_v24, %v3159_v3 }
 0x49a   :  { %v1025_v25 = vsel %vm456_vm5, %v1010_v31, 0.0 }
 0x49b   :  { %1023 = vadd.xlane.f32.xlu0 %v1022_v40  ;;  %2422 = vmatprep.subr.bf16.mxu1 %v2421_v41  ;;  %v1026_v50 = vsel %vm456_vm5, %v1011_v35, 0.0 }
 0x49c   :  { %2424 = vmatpush1.bf16.xpose.msra.mxu1 %v2423_v34  ;;  %v1027_v52 = vadd.f32 %v1026_v50, %v1025_v25 }
 0x49e   :  { %v1029_v57 = vadd.f32 %v1028_v56, %v1027_v52 }
 0x49f   :  { %2255 = vmatmul.mubr.f32.vlgmr.msra.gmra.mrb[20].mxu0 %v3121_v26 }
 0x4a0   :  { %2257 = vmatprep.mubr.f32.mxu0 %v3145_v55  ;;  %1030 = vadd.xlane.f32.xlu1 %v1029_v57 }
 0x4a3   :  { %1097 = vmatmul.mubr.f32.vlgmr.msra.gmra.mrb[16].mxu1 %v3119_v61  ;;  %2258 = vmatmul.mubr.f32.gmra.mrb[22].mxu0 %v3139_v49 }
 0x4a4   :  { %1101 = vmatprep.mubr.f32.mxu1 %v3143_v54  ;;  %1451 = vmatprep.mubr.f32.mxu0 %v2546_v20 }
 0x4a7   :  { %1102 = vmatmul.mubr.f32.gmra.mrb[18].mxu1 %v3137_v45 }
 0x4a8   :  { %1106 = vmatprep.mubr.f32.mxu1 %v3159_v3 }
 0x4ab   :  { %1107 = vmatmul.mubr.f32.gmra.mrb[20].mxu1 %v3155_v62 }
 0x4ac   :  { %1111 = vmatprep.mubr.f32.mxu1 %v3173_v24 }
 0x4af   :  { %1112 = vmatmul.mubr.f32.gmra.mrb[22].mxu1 %v3167_v18 }
 0x572   :  { %v2256_v58 = vpop.f32.mrb[20].mxu0 }
 0x573   :  { %v1183_v59 = vpop.f32.mrb[21].mxu0 }
 0x576   :  { %v1098_v60 = vpop.f32.mrb[16].mxu1  ;;  %v2259_v63 = vpop.f32.mrb[22].mxu0 }
 0x577   :  { %v1184_v0 = vadd.f32 %v1183_v59, %v1098_v60  ;;  %v1100_v5 = vpop.f32.mrb[17].mxu1  ;;  %v1193_v6 = vpop.f32.mrb[23].mxu0 }
 0x578   :  { %v1016_v5 = vpop.xlane.xlu0 %1015 }
 0x579   :  { %v1202_v8 = vsel %vm639_vm6, %v1184_v0, 0.0  ;;  %v2551_v0 = vmov 2   ;;  %v1218_v13 = vmul.f32 %v1016_v5, %v2976_v47 }
 0x57a   :  { %v1103_v1 = vpop.f32.mrb[18].mxu1  ;;  %v1206_v28 = vsel %vm647_vm7, %v1202_v8, 0.0  ;;  %2491 = vset.pattern.permute.xlu0 %v2551_v0  ;;  %2492 = vset.pattern.permute.xlu1 %v2551_v0  ;;  %v1020_v8 = vpop.xlane.xlu1 %1019 }
 0x57b   :  { %v1189_v31 = vadd.f32 %v2256_v58, %v1103_v1  ;;  %1207 = vadd.xlane.f32.xlu0 %v1206_v28  ;;  %v1105_v34 = vpop.f32.mrb[19].mxu1  ;;  %v1226_v28 = vmul.f32 %v1218_v13, %v1218_v13 }
 0x57d   :  { %v1203_v35 = vsel %vm640_vm8, %v1189_v31, 0.0 }
 0x57e   :  { %v1108_v40 = vpop.f32.mrb[20].mxu1  ;;  %v1209_v41 = vsel %vm647_vm7, %v1203_v35, 0.0 }
 0x57f   :  { %v1194_v32 = vadd.f32 %v1193_v6, %v1108_v40  ;;  %1210 = vadd.xlane.f32.xlu0 %v1209_v41  ;;  %v1110_v25 = vpop.f32.mrb[21].mxu1  ;;  %v1024_v6 = vpop.xlane.xlu0 %1023 }
 0x580   :  { %v1220_v40 = vmul.f32 %v1024_v6, %v2976_v47  ;;  %v1031_v25 = vpop.xlane.xlu1 %1030 }
 0x581   :  { %v1204_v50 = vsel %vm641_vm9, %v1194_v32, 0.0 }
 0x582   :  { %v1113_v52 = vpop.f32.mrb[22].mxu1  ;;  %v1212_v56 = vsel %vm647_vm7, %v1204_v50, 0.0 }
 0x583   :  { %v1199_v57 = vadd.f32 %v2259_v63, %v1113_v52  ;;  %1213 = vadd.xlane.f32.xlu0 %v1212_v56  ;;  %v1115_v58 = vpop.f32.mrb[23].mxu1  ;;  %v1219_v63 = vmul.f32 %v1020_v8, %v2976_v47  ;;  %v1228_v56 = vmul.f32 %v1220_v40, %v1220_v40 }
 0x585   :  { %v1205_v59 = vsel %vm642_vm10, %v1199_v57, 0.0  ;;  %v1227_v35 = vmul.f32 %v1219_v63, %v1219_v63  ;;  %v1221_v57 = vmul.f32 %v1031_v25, %v2976_v47 }
 0x586   :  { %v1215_v60 = vsel %vm657_vm11, %v1205_v59, 0.0 }
 0x587   :  { %1216 = vadd.xlane.f32.xlu1 %v1215_v60  ;;  %v1229_v5 = vmul.f32 %v1221_v57, %v1221_v57 }
 0x608   :  { %v1208_v1 = vpop.xlane.xlu0 %1207 }
 0x609   :  { %v1222_v31 = vmul.f32 %v1208_v1, %v2976_v47 }
 0x60b   :  { %v1230_v34 = vsub.f32 %v1222_v31, %v1226_v28 }
 0x60c   :  { %v1211_v29 = vpop.xlane.xlu0 %1210 }
 0x60d   :  { %v1234_v41 = vadd.f32 1e-05, %v1230_v34  ;;  %v1223_v32 = vmul.f32 %v1211_v29, %v2976_v47 }
 0x60f   :  { %2510 = vrsqrt.f32 %v1234_v41  ;;  %v1231_v50 = vsub.f32 %v1223_v32, %v1227_v35 }
 0x610   :  { %v1214_v52 = vpop.xlane.xlu0 %1213 }
 0x611   :  { %v1235_v58 = vadd.f32 1e-05, %v1231_v50  ;;  %v1224_v59 = vmul.f32 %v1214_v52, %v2976_v47 }
 0x613   :  { %2512 = vrsqrt.f32 %v1235_v58  ;;  %v1232_v60 = vsub.f32 %v1224_v59, %v1228_v56  ;;  %v2552_v59 = vmov 3  }
 0x614   :  { %v1217_v0 = vpop.xlane.xlu1 %1216 }
 0x615   :  { %v1236_v8 = vadd.f32 1e-05, %v1232_v60  ;;  %v1225_v6 = vmul.f32 %v1217_v0, %v2976_v47 }
 0x617   :  { %2514 = vrsqrt.f32 %v1236_v8  ;;  %v1233_v1 = vsub.f32 %v1225_v6, %v1229_v5 }
 0x619   :  { %v2511_v28 = vpop.eup %2510  ;;  %v1237_v31 = vadd.f32 1e-05, %v1233_v1  ;;  %v3234_v1 = vld [vmem:[%s3383_s4] sm:$0xff] }
 0x61a   :  { %v1242_v34 = vmul.f32 %v2511_v28, %v2989_v17  ;;  %2268 = vmatprep.mubr.msk.f32.mxu1 %vm647_vm7, %v3234_v1 }
 0x61b   :  { %2516 = vrsqrt.f32 %v1237_v31 }
 0x61c   :  { %v1246_v29 = vmul.f32 %v1242_v34, %v1218_v13 }
 0x61d   :  { %v2513_v35 = vpop.eup %2512 }
 0x61e   :  { %1254 = vrot.lane.b32.xlu0 %v1246_v29, %s2548_s20  ;;  %v1243_v41 = vmul.f32 %v2513_v35, %v2995_v30 }
 0x620   :  { %v1247_v32 = vmul.f32 %v1243_v41, %v1219_v63 }
 0x621   :  { %v2515_v25 = vpop.eup %2514 }
 0x622   :  { %1272 = vperm.xlu0 %2491, %v1242_v34   ;;  %1256 = vrot.lane.b32.xlu1 %v1247_v32, %s2548_s20  ;;  %v1244_v50 = vmul.f32 %v2515_v25, %v3002_v38 }
 0x624   :  { %v1248_v52 = vmul.f32 %v1244_v50, %v1220_v40 }
 0x625   :  { %v2517_v56 = vpop.eup %2516 }
 0x626   :  { %1258 = vrot.lane.b32.xlu1 %v1248_v52, %s2548_s20  ;;  %v1245_v58 = vmul.f32 %v2517_v56, %v3009_v42  ;;  %2494 = vset.pattern.permute.xlu0 %v2552_v59 }
 0x628   :  { %v1249_v13 = vmul.f32 %v1245_v58, %v1221_v57 }
 0x62a   :  { %1260 = vrot.lane.b32.xlu1 %v1249_v13, %s2548_s20 }
 0x62e   :  { %1277 = vperm.xlu1 %2492, %v1243_v41  }
 0x632   :  { %1282 = vperm.xlu1 %2492, %v1244_v50  }
 0x636   :  { %1287 = vperm.xlu1 %2492, %v1245_v58  }
 0x63a   :  { %2493 = vset.pattern.permute.xlu1 %v2552_v59 }
 0x690   :  { %v1255_v63 = vpop.permute.xlu0 %1254 }
 0x691   :  { %v1266_v60 = vsub.f32 %v2989_v17, %v1255_v63 }
 0x693   :  { %1304 = vperm.xlu1 %2493, %v1266_v60  }
 0x694   :  { %v1257_v0 = vpop.permute.xlu1 %1256 }
 0x695   :  { %v1267_v40 = vsub.f32 %v2995_v30, %v1257_v0 }
 0x697   :  { %1309 = vperm.xlu0 %2494, %v1267_v40  }
 0x698   :  { %v1259_v5 = vpop.permute.xlu1 %1258 }
 0x699   :  { %v1268_v8 = vsub.f32 %v3002_v38, %v1259_v5 }
 0x69b   :  { %1314 = vperm.xlu0 %2494, %v1268_v8  }
 0x69c   :  { %v1261_v6 = vpop.permute.xlu1 %1260 }
 0x69d   :  { %v1269_v57 = vsub.f32 %v3009_v42, %v1261_v6 }
 0x69f   :  { %1319 = vperm.xlu1 %2493, %v1269_v57  }
 0x6a1   :  { %v1273_v34 = vpop.permute.xlu0 %1272 }
 0x6a2   :  { %v1290_v35 = vmul.f32 %v1273_v34, %v3119_v61  ;;  %v1291_v38 = vmul.f32 %v1273_v34, %v3123_v27  ;;  %v1292_v41 = vmul.f32 %v1273_v34, %v3125_v39 }
 0x6ad   :  { %v1278_v28 = vpop.permute.xlu1 %1277 }
 0x6ae   :  { %v1293_v52 = vmul.f32 %v1278_v28, %v3137_v45  ;;  %v1294_v59 = vmul.f32 %v1278_v28, %v3143_v54  ;;  %v1295_v13 = vmul.f32 %v3121_v26, %v1278_v28 }
 0x6b1   :  { %v1283_v31 = vpop.permute.xlu1 %1282 }
 0x6b2   :  { %v1296_v61 = vmul.f32 %v1283_v31, %v3155_v62  ;;  %v1297_v27 = vmul.f32 %v1283_v31, %v3159_v3  ;;  %v1298_v5 = vmul.f32 %v1283_v31, %v3145_v55 }
 0x6b5   :  { %v1288_v29 = vpop.permute.xlu1 %1287 }
 0x6b6   :  { %v1299_v54 = vmul.f32 %v1288_v29, %v3167_v18  ;;  %v1301_v55 = vmul.f32 %v3139_v49, %v1288_v29 }
 0x712   :  { %v1305_v42 = vpop.permute.xlu1 %1304 }
 0x713   :  { %v1322_v32 = vadd.f32 %v1305_v42, %v1290_v35  ;;  %v1323_v25 = vadd.f32 %v1305_v42, %v1291_v38  ;;  %v1324_v50 = vadd.f32 %v1305_v42, %v1292_v41  ;;  %v1300_v41 = vmul.f32 %v1288_v29, %v3173_v24 }
 0x715   :  { %v1335_v56 = vmax.f32 %v1323_v25, 0.0  ;;  %v1336_v58 = vmax.f32 %v1324_v50, 0.0  ;;  %v1334_v63 = vmax.f32 %v1322_v32, 0.0 }
 0x716   :  { %v1310_v60 = vpop.permute.xlu0 %1309 }
 0x717   :  { %v1325_v0 = vadd.f32 %v1310_v60, %v1293_v52  ;;  %v1326_v39 = vadd.f32 %v1310_v60, %v1294_v59  ;;  %v1327_v40 = vadd.f32 %v1310_v60, %v1295_v13  ;;  %v1347_v8 = vmul.f32 %v2859_v22, %v1335_v56 }
 0x718   :  { %v1348_v45 = vmul.f32 %v2862_v23, %v1336_v58  ;;  %v1346_v26 = vmul.f32 %v2856_v21, %v1334_v63 }
 0x719   :  { %v1337_v6 = vmax.f32 %v1325_v0, 0.0  ;;  %v1338_v57 = vmax.f32 %v1326_v39, 0.0  ;;  %v1339_v28 = vmax.f32 %v1327_v40, 0.0  ;;  %v1359_v25 = vadd.f32 %v1347_v8, %v3041_v48 }
 0x71a   :  { %v1315_v34 = vpop.permute.xlu0 %1314  ;;  %v1360_v50 = vadd.f32 %v1348_v45, %v3044_v43  ;;  %v1358_v49 = vadd.f32 %v1346_v26, %v3035_v36 }
 0x71b   :  { %v1349_v62 = vmul.f32 %v2856_v21, %v1337_v6  ;;  %v1328_v35 = vadd.f32 %v1315_v34, %v1296_v61  ;;  %v1329_v3 = vadd.f32 %v1315_v34, %v1297_v27  ;;  %v1330_v38 = vadd.f32 %v1315_v34, %v1298_v5 }
 0x71c   :  { %v1350_v31 = vmul.f32 %v2859_v22, %v1338_v57  ;;  %v1351_v42 = vmul.f32 %v2862_v23, %v1339_v28 }
 0x71d   :  { %v1340_v32 = vmax.f32 %v1328_v35, 0.0  ;;  %v1341_v18 = vmax.f32 %v1329_v3, 0.0  ;;  %v1361_v52 = vadd.f32 %v1349_v62, %v3038_v44  ;;  %v1342_v56 = vmax.f32 %v1330_v38, 0.0 }
 0x71e   :  { %v1320_v58 = vpop.permute.xlu1 %1319  ;;  %v1362_v59 = vadd.f32 %v1350_v31, %v3047_v46  ;;  %v1363_v24 = vadd.f32 %v1351_v42, %v3050_v37 }
 0x71f   :  { %v1331_v29 = vadd.f32 %v1320_v58, %v1299_v54  ;;  %v1332_v13 = vadd.f32 %v1320_v58, %v1300_v41  ;;  %v1333_v63 = vadd.f32 %v1320_v58, %v1301_v55  ;;  %v1352_v61 = vmul.f32 %v2856_v21, %v1340_v32 }
 0x720   :  { %v2433_v60 = vpack.c.bf16 %v1362_v59, %v1359_v25  ;;  %v2443_v0 = vpack.c.bf16 %v1363_v24, %v1360_v50  ;;  %v1353_v48 = vmul.f32 %v2859_v22, %v1341_v18  ;;  %v1354_v44 = vmul.f32 %v2862_v23, %v1342_v56 }
 0x721   :  { %v1343_v43 = vmax.f32 %v1331_v29, 0.0  ;;  %v1344_v27 = vmax.f32 %v1332_v13, 0.0  ;;  %v1345_v39 = vmax.f32 %v1333_v63, 0.0  ;;  %v2435_v46 = vpack.c.bf16 %v1361_v52, %v1358_v49 }
 0x722   :  { %2434 = vmatprep.subr.bf16.mxu0 %v2433_v60  ;;  %2444 = vmatprep.subr.bf16.mxu1 %v2443_v0  ;;  %v1364_v5 = vadd.f32 %v1352_v61, %v3062_v9  ;;  %v1365_v45 = vadd.f32 %v1353_v48, %v3068_v11  ;;  %v1366_v6 = vadd.f32 %v1354_v44, %v3071_v12  ;;  %v1371_v9 = vld [vmem:[%s3383_s4 + $0x8] sm:$0x3]  ;;  %v2553_v48 = vmov 4  }
 0x723   :  { %v1355_v37 = vmul.f32 %v2856_v21, %v1343_v43  ;;  %2446 = vmatpush3.bf16.msra.mxu1 %v2443_v0  ;;  %v1356_v36 = vmul.f32 %v2859_v22, %v1344_v27  ;;  %v1357_v40 = vmul.f32 %v2862_v23, %v1345_v39  ;;  %2436 = vmatpush1.bf16.msra.mxu0 %v2435_v46 }
 0x724   :  { %2495 = vset.pattern.permute.xlu1 %v2553_v48 }
 0x725   :  { %v1367_v8 = vadd.f32 %v1355_v37, %v3065_v10  ;;  %v1368_v54 = vadd.f32 %v1356_v36, %v3074_v4  ;;  %v1369_v26 = vadd.f32 %v1357_v40, %v3077_v14 }
 0x727   :  { %v2440_v57 = vpack.c.bf16 %v1367_v8, %v1364_v5  ;;  %v2437_v28 = vpack.c.bf16 %v1368_v54, %v1365_v45  ;;  %v2447_v34 = vpack.c.bf16 %v1369_v26, %v1366_v6  ;;  %v2554_v54 = vmov 5  }
 0x728   :  { %2496 = vset.pattern.permute.xlu0 %v2554_v54 }
 0x729   :  { %2439 = vmatprep.subr.msk.bf16.mxu0 %vm3083_vm13, %v2437_v28  ;;  %2449 = vmatprep.subr.msk.bf16.mxu1 %vm3083_vm13, %v2447_v34 }
 0x72a   :  { %2442 = vmatpush1.bf16.msk.msra.mxu0 %vm3083_vm13, %v2440_v57  ;;  %2452 = vmatpush3.bf16.msk.msra.mxu1 %vm3083_vm13, %v2447_v34 }
 0x72d   :  { %2073 = vmatmul.mubr.msk.f32.vlgmr.msra.gmra.mrb[24].mxu0 %vm647_vm7, %v3234_v1  ;;  %2269 = vmatmul.mubr.msk.f32.vlgmr.msra.gmra.mrb[24].mxu1 %vm647_vm7, %v1371_v9 }
 0x72e   :  { %1457 = vmatprep.mubr.f32.mxu0 %v2546_v20 }
 0x731   :  { %2074 = vmatmul.mubr.msk.f32.gmra.mrb[26].mxu0 %vm647_vm7, %v1371_v9 }
 0x800   :  { %v3290_v10 = vpop.f32.mrb[24].mxu0  ;;  %v3292_v11 = vpop.f32.mrb[24].mxu1 }
 0x801   :  { %v3294_v12 = vpop.f32.mrb[25].mxu0  ;;  %v3296_v4 = vpop.f32.mrb[25].mxu1  ;;  %v1539_v14 = vmul.f32 %v2856_v21, %v3290_v10  ;;  %v1544_v18 = vmul.f32 %v3292_v11, %v2862_v23 }
 0x802   :  { %1621 = vmatprep.mubr.f32.mxu0 %v3294_v12  ;;  %v2457_v19 = vpack.c.bf16 %v3292_v11, %v3296_v4  ;;  %2275 = vmatprep.mubr.f32.mxu1 %v3296_v4  ;;  %v1540_v1 = vmul.f32 %v2859_v22, %v3294_v12  ;;  %v1541_v62 = vmul.f32 %v2862_v23, %v3296_v4 }
 0x803   :  { %v1553_v52 = vsel %vm1549_vm14, %v1544_v18, 0.0 }
 0x804   :  { %v3308_v35 = vpop.f32.mrb[26].mxu0  ;;  %2458 = vmatprep.subr.bf16.mxu1 %v2457_v19  ;;  %v1545_v3 = vadd.f32 %v1540_v1, %v1539_v14 }
 0x805   :  { %v1542_v38 = vmul.f32 %v2856_v21, %v3308_v35  ;;  %v2455_v41 = vpack.c.bf16 %v3308_v35, %v3290_v10  ;;  %v3314_v55 = vpop.f32.mrb[27].mxu0  ;;  %2460 = vmatpush3.bf16.xpose.msra.mxu1 %v2457_v19 }
 0x806   :  { %v1543_v31 = vmul.f32 %v2859_v22, %v3314_v55  ;;  %v1546_v42 = vadd.f32 %v1545_v3, %v1541_v62  ;;  %v2453_v32 = vpack.c.bf16 %v3314_v55, %v3294_v12  ;;  %v2555_v3 = vmov 0.0|0.0  }
 0x807   :  { %v1550_v25 = vsel %vm1549_vm14, %v1542_v38, 0.0  ;;  %v2557_v38 = vmov 6  }
 0x808   :  { %1547 = vadd.xlane.f32.xlu0 %v1546_v42  ;;  %2454 = vmatprep.subr.bf16.mxu0 %v2453_v32  ;;  %v1551_v21 = vsel %vm1549_vm14, %v1543_v31, 0.0 }
 0x809   :  { %2456 = vmatpush1.bf16.xpose.msra.mxu0 %v2455_v41  ;;  %v1552_v50 = vadd.f32 %v1551_v21, %v1550_v25 }
 0x80a   :  { %2467 = vmatprep.subr.bf16.mxu0 %v2555_v3 }
 0x80b   :  { %v1554_v56 = vadd.f32 %v1553_v52, %v1552_v50 }
 0x80c   :  { %2276 = vmatmul.mubr.f32.vlgmr.msra.gmra.mrb[26].mxu1 %v3292_v11 }
 0x80d   :  { %1555 = vadd.xlane.f32.xlu1 %v1554_v56  ;;  %1867 = vmatprep.mubr.f32.mxu1 %v2546_v20 }
 0x810   :  { %1622 = vmatmul.mubr.f32.vlgmr.msra.gmra.mrb[28].mxu0 %v3290_v10 }
 0x811   :  { %1626 = vmatprep.mubr.f32.mxu0 %v3314_v55 }
 0x814   :  { %1627 = vmatmul.mubr.f32.gmra.mrb[30].mxu0 %v3308_v35 }
 0x815   :  { %2282 = vmatprep.mubr.msk.f32.mxu0 %vm2556_vm1, %v2546_v20 }
 0x895   :  { %v1548_v43 = vpop.xlane.xlu0 %1547 }
 0x896   :  { %v1717_v44 = vmul.f32 %v1548_v43, %v2976_v47 }
 0x898   :  { %v1721_v46 = vmul.f32 %v1717_v44, %v1717_v44 }
 0x89a   :  { %v1556_v27 = vpop.xlane.xlu1 %1555 }
 0x89b   :  { %v1718_v37 = vmul.f32 %v1556_v27, %v2976_v47  ;;  %v1786_v27 = vrot.slane %v2914_v53, 6 }
 0x89d   :  { %v1722_v8 = vmul.f32 %v1718_v37, %v1718_v37 }
 0x8df   :  { %v2277_v22 = vpop.f32.mrb[26].mxu1 }
 0x8e0   :  { %v1698_v23 = vpop.f32.mrb[27].mxu1 }
 0x8e3   :  { %v1623_v58 = vpop.f32.mrb[28].mxu0 }
 0x8e4   :  { %v1699_v59 = vadd.f32 %v1698_v23, %v1623_v58  ;;  %v1625_v24 = vpop.f32.mrb[29].mxu0 }
 0x8e6   :  { %v1707_v49 = vsel %vm639_vm6, %v1699_v59, 0.0 }
 0x8e7   :  { %v1628_v29 = vpop.f32.mrb[30].mxu0  ;;  %v1710_v13 = vsel %vm1709_vm15, %v1707_v49, 0.0 }
 0x8e8   :  { %v1704_v63 = vadd.f32 %v2277_v22, %v1628_v29  ;;  %1711 = vadd.xlane.f32.xlu0 %v1710_v13  ;;  %v1630_v60 = vpop.f32.mrb[31].mxu0 }
 0x8ea   :  { %v1708_v0 = vsel %vm640_vm8, %v1704_v63, 0.0  ;;  %v2558_v63 = vmov 1966171168  }
 0x8eb   :  { %v1714_v61 = vsel %vm1713_vm0, %v1708_v0, 0.0  ;;  %v1960_v60 = vunpack.c.l.s4 %v2558_v63 }
 0x8ec   :  { %1715 = vadd.xlane.f32.xlu0 %v1714_v61  ;;  %v1785_v61 = vrot.slane %v2912_v51, 6 }
 0x975   :  { %v1712_v39 = vpop.xlane.xlu0 %1711 }
 0x976   :  { %v1719_v36 = vmul.f32 %v1712_v39, %v2976_v47 }
 0x978   :  { %v1723_v40 = vsub.f32 %v1719_v36, %v1721_v46 }
 0x979   :  { %v1716_v5 = vpop.xlane.xlu0 %1715 }
 0x97a   :  { %v1725_v45 = vadd.f32 1e-05, %v1723_v40  ;;  %v1720_v16 = vmul.f32 %v1716_v5, %v2976_v47  ;;  %v1961_v40 = vunpack.c.0.s8 %v1960_v60 }
 0x97c   :  { %2518 = vrsqrt.f32 %v1725_v45  ;;  %v1724_v7 = vsub.f32 %v1720_v16, %v1722_v8 }
 0x97e   :  { %v1726_v6 = vadd.f32 1e-05, %v1724_v7 }
 0x980   :  { %2520 = vrsqrt.f32 %v1726_v6 }
 0x986   :  { %v2519_v26 = vpop.eup %2518 }
 0x987   :  { %v1729_v57 = vmul.f32 %v2519_v26, %v2989_v17 }
 0x989   :  { %v1731_v28 = vmul.f32 %v1729_v57, %v1717_v44 }
 0x98a   :  { %v2521_v34 = vpop.eup %2520 }
 0x98b   :  { %1735 = vrot.lane.b32.xlu0 %v1731_v28, %s2548_s20  ;;  %v1730_v9 = vmul.f32 %v2521_v34, %v2995_v30 }
 0x98d   :  { %v1732_v14 = vmul.f32 %v1730_v9, %v1718_v37 }
 0x98f   :  { %1737 = vrot.lane.b32.xlu1 %v1732_v14, %s2548_s20 }
 0x993   :  { %1745 = vperm.xlu1 %2495, %v1729_v57  }
 0x997   :  { %1750 = vperm.xlu1 %2495, %v1730_v9  }
 0x99b   :  { %2497 = vset.pattern.permute.xlu1 %v2554_v54 }
 0x9fd   :  { %v1736_v47 = vpop.permute.xlu0 %1735 }
 0x9fe   :  { %v1741_v19 = vsub.f32 %v2989_v17, %v1736_v47 }
 0xa00   :  { %1761 = vperm.xlu0 %2496, %v1741_v19  }
 0xa01   :  { %v1738_v1 = vpop.permute.xlu1 %1737 }
 0xa02   :  { %v1742_v62 = vsub.f32 %v2995_v30, %v1738_v1 }
 0xa04   :  { %1766 = vperm.xlu1 %2497, %v1742_v62   ;;  %2499 = vset.pattern.permute.xlu0 %v2557_v38 }
 0xa08   :  { %2498 = vset.pattern.permute.xlu1 %v2557_v38 }
 0xa09   :  { %1946 = vperm.xlu1 %2498, %v2989_v17  }
 0xa12   :  { %v1746_v41 = vpop.permute.xlu1 %1745 }
 0xa13   :  { %v1753_v31 = vmul.f32 %v1746_v41, %v3290_v10  ;;  %v1754_v42 = vmul.f32 %v1746_v41, %v3294_v12  ;;  %v1755_v30 = vmul.f32 %v1746_v41, %v3296_v4 }
 0xa16   :  { %v1751_v32 = vpop.permute.xlu1 %1750 }
 0xa17   :  { %v1756_v50 = vmul.f32 %v1751_v32, %v3308_v35  ;;  %v1757_v20 = vmul.f32 %v1751_v32, %v3314_v55  ;;  %v1758_v52 = vmul.f32 %v3292_v11, %v1751_v32  ;;  %v1781_v11 = vld [vmem:[%s3384_s5] sm:$0x1]  ;;  %v1787_v55 = vrot.slane %v2884_v33, 6  ;;  %s2559_s5 = smov [#allocation4]  }
 0xa18   :  { %v1964_v33 = vsub.s32 %v1961_v40, %v2941_v2  ;;  %s1993_s12 = sshll.u32 %s2559_s5, 4  ;;  %s1994_s12 = int_to_ptr.vmem [resolvable:$true] %s1993_s12 }
 0xa19   :  { %s2522_s13 = scalar_lea.vmem %s1994_s12, 48  ;;  %s2526_s14 = scalar_lea.vmem %s1994_s12, 64 }
 0xa1a   :  { %p2523_p0 = scmp.ne.s32.totalorder %s1994_s12, %s2522_s13  ;;  %p2527_p1 = scmp.lt.s32.totalorder %s1994_s12, %s1994_s12 }
 0xa1b   :  { %p2528_p2 = scmp.lt.s32.totalorder %s2526_s14, %s2522_s13 }
 0xa1d   :  { %p2529_p3 = por %p2528_p2, %p2527_p1 }
 0xa1f   :  { %p2530_p4 = pnand %p2529_p3, %p2523_p0 }
 0xa7f   :  { %v1762_v18 = vpop.permute.xlu0 %1761 }
 0xa80   :  { %v1769_v25 = vadd.f32 %v1762_v18, %v1753_v31  ;;  %v1770_v21 = vadd.f32 %v1762_v18, %v1754_v42  ;;  %v1771_v56 = vadd.f32 %v1762_v18, %v1755_v30 }
 0xa82   :  { %v1775_v10 = vmax.f32 %v1769_v25, 0.0  ;;  %v1776_v59 = vmax.f32 %v1770_v21, 0.0  ;;  %v1777_v12 = vmax.f32 %v1771_v56, 0.0 }
 0xa83   :  { %v1767_v22 = vpop.permute.xlu1 %1766 }
 0xa84   :  { %v1772_v17 = vadd.f32 %v1767_v22, %v1756_v50  ;;  %v1773_v23 = vadd.f32 %v1767_v22, %v1757_v20  ;;  %v1774_v58 = vadd.f32 %v1767_v22, %v1758_v52 }
 0xa86   :  { %v1778_v24 = vmax.f32 %v1772_v17, 0.0  ;;  %v1779_v49 = vmax.f32 %v1773_v23, 0.0  ;;  %v1780_v29 = vmax.f32 %v1774_v58, 0.0 }
 0xa88   :  { %v2461_v4 = vpack.c.bf16 %v1779_v49, %v1776_v59  ;;  %v2464_v35 = vpack.c.bf16 %v1778_v24, %v1775_v10  ;;  %v2468_v13 = vpack.c.bf16 %v1780_v29, %v1777_v12  ;;  %v1947_v48 = vpop.permute.xlu1 %1946 }
 0xa8a   :  { %2463 = vmatprep.subr.msk.bf16.mxu1 %vm2462_vm2, %v2461_v4  ;;  %2470 = vmatpush3.bf16.msk.msra.mxu0 %vm2462_vm2, %v2468_v13 }
 0xa8b   :  { %2466 = vmatpush1.bf16.msk.msra.mxu1 %vm2462_vm2, %v2464_v35 }
 0xa8d   :  { %2283 = vmatmul.mubr.msk.f32.vlgmr.msra.gmra.mrb[32].mxu0 %vm1709_vm15, %v1781_v11 }
 0xa8e   :  { %2080 = vmatmul.mubr.msk.f32.vlgmr.msra.gmra.mrb[28].mxu1 %vm1709_vm15, %v1781_v11 }
 0xb60   :  { %v1940_v0 = vpop.f32.mrb[32].mxu0 }
 0xb61   :  { %v1941_v43 = vadd.f32 %v1940_v0, %v1787_v55  ;;  %v1869_v44 = vpop.f32.mrb[28].mxu1  ;;  %v2284_v39 = vpop.f32.mrb[33].mxu0 }
 0xb62   :  { %v1870_v46 = vadd.f32 %v1869_v44, %v1785_v61  ;;  %v1871_v37 = vpop.f32.mrb[29].mxu1 }
 0xb63   :  { %v1872_v36 = vadd.f32 %v1871_v37, %v1786_v27  ;;  %v1951_v5 = vadd.f32 %v1947_v48, %v1941_v43 }
 0xb64   :  { %v1949_v8 = vadd.f32 %v1947_v48, %v1870_v46 }
 0xb65   :  { %v1950_v45 = vadd.f32 %v1947_v48, %v1872_v36  ;;  %v1954_v6 = vmax.f32 %v1951_v5, 0.0 }
 0xb66   :  { %v1952_v16 = vmax.f32 %v1949_v8, 0.0 }
 0xb67   :  { %v1953_v7 = vmax.f32 %v1950_v45, 0.0  ;;  %v1972_v26 = vrot.slane %v1954_v6, %v1964_v33 }
 0xb69   :  { %v1958_v54 = vcombine.low %v1952_v16, %v1953_v7 }
 0xb6b   :  { %v1965_v51 = vrot.slane %v1958_v54, %v1964_v33 }
 0xb6d   :  { %v1973_v57 = vcombine.low %v1965_v51, %v1972_v26 }
 0xb6f   :  { %v1980_v53 = vrot.slane %v1973_v57, %v1964_v33 }
 0xb71   :  { %1986 = vst.msk [vmem:[#allocation4] sm:$0x7] %vm1984_vm3, %v1980_v53 }
 0xb72   :  { %2533 = shalt.err (!%p2530_p4)
}
 0xb73   :  { %s2534_s0 = scalar_lea.hbm %s3386_s7, 48 }
 0xb74   :  { %p2535_p5 = scmp.ne.s32.totalorder %s3386_s7, %s2534_s0  ;;  %p2538_p6 = scmp.lt.u32.totalorder %s2534_s0, %s3386_s7 }
 0xb76   :  { %p2540_p7 = pnand %p2538_p6, %p2535_p5 }
 0xb78   :  { %2543 = shalt.err (!%p2540_p7)
}
 0xb79   :  { %1996 = dma.vmem_to_hbm [thread:$0]  %s1994_s12, 48, %s3386_s7, [#allocation5]  }
 0xb7a   :  { %2544 = dma.done.wait [#allocation5], 48  }
 0xb7b   :  { %2545 = vsyncadd [#allocation5], 4294967248 }
 0xb7c   :  { %2000 = vsyncpa [#allocation5], 1 }

</bundles_post_ra>
